<compile_context>
chip_gen: v5e
topology: v5e:2x2
jax: 0.10.0
libtpu: 0.0.40
codegen_flags: <defaults>
</compile_context>

<pallas_src>
import math
import random

import jax
import jax.numpy as jnp
from jax.experimental import pallas as pl
from jax.experimental.pallas import tpu as pltpu


def _cell_update(gates, c, H):
    """Apply LSTM nonlinearities given pre-activation gates (B, 4H)."""
    i = jax.nn.sigmoid(gates[:, 0 * H:1 * H])
    f = jax.nn.sigmoid(gates[:, 1 * H:2 * H])
    g = jnp.tanh(gates[:, 2 * H:3 * H])
    o = jax.nn.sigmoid(gates[:, 3 * H:4 * H])
    c_new = f * c + i * g
    h_new = o * jnp.tanh(c_new)
    return h_new, c_new


def seq2seq_kernel(src_ref, trg_ref, tf_ref,
                   e_wih_ref, e_whh_ref, e_b_ref,
                   d_wih_ref, d_whh_ref, d_b_ref,
                   fc_w_ref, fc_b_ref, out_ref):
    S, B, F = src_ref.shape
    H = e_whh_ref.shape[0]
    T = out_ref.shape[1]

    # ---------------- Encoder ----------------
    src = src_ref[...]                                    # (S, B, F), loaded once
    e_whh = e_whh_ref[...]

    # One batched MXU matmul for all S timesteps; encoder bias folded in here so
    # the broadcast happens exactly once (JAX does not CSE broadcast_in_dim).
    gates_x = (jnp.dot(src.reshape(S * B, F), e_wih_ref[...],
                       preferred_element_type=jnp.float32)
               + e_b_ref[...])                            # (S*B, 4H)

    h = jnp.zeros((B, H), jnp.float32)
    c = jnp.zeros((B, H), jnp.float32)
    for t in range(S):                                    # short static seq -> unrolled
        gates = gates_x[t * B:(t + 1) * B, :] + jnp.dot(
            h, e_whh, preferred_element_type=jnp.float32)
        h, c = _cell_update(gates, c, H)

    # ---------------- Decoder ----------------
    d_wih = d_wih_ref[...]                                # (1, 4H), input_size = 1
    d_whh = d_whh_ref[...]
    d_bias = jnp.broadcast_to(d_b_ref[...], (B, 4 * H))   # hoisted broadcast
    fc_w = fc_w_ref[...]                                  # (1, H)   (out x in)
    fc_b = fc_b_ref[...]                                  # (1, 1)
    trg = trg_ref[...]                                    # (B, T)

    # decoder_input = src[:, -1, -1].unsqueeze(1)  -> (B, 1)
    dec_in = src[S - 1, :, F - 1:F]

    ys = []
    for t in range(T):
        # K=1 input projection as a VPU outer product; only the hidden matmul
        # stays on the MXU inside the serial dependency chain.
        gates = (dec_in * d_wih
                 + jnp.dot(h, d_whh, preferred_element_type=jnp.float32)
                 + d_bias)
        h, c = _cell_update(gates, c, H)

        # FC head (H -> 1) as VPU multiply + lane reduction instead of N=1 matmul.
        y_t = jnp.sum(h * fc_w, axis=-1, keepdims=True) + fc_b      # (B, 1)
        ys.append(y_t)

        # Teacher forcing decided host-side, applied as a 1-op select (no recompile).
        tf_t = tf_ref[t]                                            # int32 scalar (SMEM)
        dec_in = jnp.where(tf_t > 0, trg[:, t:t + 1], y_t)

    # Single final store instead of T masked 1-lane stores in the loop.
    out_ref[...] = jnp.concatenate(ys, axis=-1)                     # (B, T)


def seq2seq_forward(src, trg, params, tf_flags):
    """src: (B,S,F) f32, trg: (B,T) f32, tf_flags: length-T 0/1 ints (runtime)."""
    B, S, F = src.shape
    T = trg.shape[1]
    # Layout plumbing only: present timesteps on the leading (sublane-contiguous) axis.
    src_sbf = jnp.transpose(src, (1, 0, 2))               # (S, B, F)
    tf_arr = jnp.asarray(tf_flags, dtype=jnp.int32)       # (T,)

    vmem = pl.BlockSpec(memory_space=pltpu.MemorySpace.VMEM)
    smem = pl.BlockSpec(memory_space=pltpu.MemorySpace.SMEM)

    out = pl.pallas_call(
        seq2seq_kernel,
        out_shape=jax.ShapeDtypeStruct((B, T), jnp.float32),
        in_specs=[vmem, vmem, smem] + [vmem] * len(params),
        out_specs=vmem,
    )(src_sbf, trg, tf_arr, *params)
    # decoder_output_size == 1 -> output is already the squeezed (B, T) tensor.
    return out


def init_params(key, input_size, hidden_size, output_size=1):
    """Deterministic init matching PyTorch LSTM/Linear shapes (U(-1/sqrt(H), 1/sqrt(H)))."""
    H = hidden_size
    bound = 1.0 / math.sqrt(H)
    keys = jax.random.split(key, 8)

    def u(k_, shape):
        return jax.random.uniform(k_, shape, jnp.float32, -bound, bound)

    e_wih = u(keys[0], (input_size, 4 * H))   # encoder weight_ih^T
    e_whh = u(keys[1], (H, 4 * H))            # encoder weight_hh^T
    e_b = u(keys[2], (1, 4 * H))              # encoder (b_ih + b_hh)
    d_wih = u(keys[3], (1, 4 * H))            # decoder weight_ih^T (input_size=1)
    d_whh = u(keys[4], (H, 4 * H))            # decoder weight_hh^T
    d_b = u(keys[5], (1, 4 * H))              # decoder (b_ih + b_hh)
    fc_w = u(keys[6], (output_size, H))       # decoder.fc weight (PyTorch out x in)
    fc_b = u(keys[7], (output_size, output_size))  # decoder.fc bias, kept 2-D (1,1)
    return (e_wih, e_whh, e_b, d_wih, d_whh, d_b, fc_w, fc_b)


if __name__ == "__main__":
    # ETT-style 7 input features, hidden=32 (4H=128 = one full lane group),
    # src_len=8, trg_len=4, output_size=1. Batch = 8 to fill all f32 sublanes.
    B, S, F, H, T = 8, 8, 7, 32, 4

    key = jax.random.PRNGKey(0)
    k_src, k_trg, k_param = jax.random.split(key, 3)
    src = jax.random.normal(k_src, (B, S, F), jnp.float32)
    trg = jax.random.normal(k_trg, (B, T), jnp.float32)
    params = init_params(k_param, F, H, output_size=1)

    # Host-side teacher-forcing decisions (same semantics as the PyTorch loop);
    # passed to the kernel as runtime data, so new draws do NOT recompile.
    random.seed(0)
    tf_flags = [1 if random.random() < 0.5 else 0 for _ in range(T)]

    out = seq2seq_forward(src, trg, params, tf_flags)
    jax.block_until_ready(out)
    assert out.shape == (B, T) and out.dtype == jnp.float32
    print("KERNEL_OK")
</pallas_src>

<mosaic_0001>
module attributes {stable_mosaic.version = 11 : i64} {
  func.func @seq2seq_kernel(%arg0: memref<8x8x7xf32, #tpu.memory_space<vmem>>, %arg1: memref<8x4xf32, #tpu.memory_space<vmem>>, %arg2: memref<4xi32, #tpu.memory_space<smem>>, %arg3: memref<7x128xf32, #tpu.memory_space<vmem>>, %arg4: memref<32x128xf32, #tpu.memory_space<vmem>>, %arg5: memref<1x128xf32, #tpu.memory_space<vmem>>, %arg6: memref<1x128xf32, #tpu.memory_space<vmem>>, %arg7: memref<32x128xf32, #tpu.memory_space<vmem>>, %arg8: memref<1x128xf32, #tpu.memory_space<vmem>>, %arg9: memref<1x32xf32, #tpu.memory_space<vmem>>, %arg10: memref<1x1xf32, #tpu.memory_space<vmem>>, %arg11: memref<8x4xf32, #tpu.memory_space<vmem>>) attributes {dimension_semantics = [], scalar_prefetch = 0 : i64, scratch_operands = 0 : i64, tpu.core_type = #tpu.core_type<tc>} {
    %c0 = arith.constant 0 : index
    %c0_0 = arith.constant 0 : index
    %c0_1 = arith.constant 0 : index
    %0 = vector.load %arg0[%c0, %c0_0, %c0_1] : memref<8x8x7xf32, #tpu.memory_space<vmem>>, vector<8x8x7xf32>
    %c0_2 = arith.constant 0 : index
    %c0_3 = arith.constant 0 : index
    %1 = vector.load %arg4[%c0_2, %c0_3] : memref<32x128xf32, #tpu.memory_space<vmem>>, vector<32x128xf32>
    %2 = vector.shape_cast %0 : vector<8x8x7xf32> to vector<64x7xf32>
    %c0_4 = arith.constant 0 : index
    %c0_5 = arith.constant 0 : index
    %3 = vector.load %arg3[%c0_4, %c0_5] : memref<7x128xf32, #tpu.memory_space<vmem>>, vector<7x128xf32>
    %cst = arith.constant dense<0.000000e+00> : vector<64x128xf32>
    %4 = tpu.matmul %2, %3, %cst {dimension_numbers = #tpu.dot_dimension_numbers<[1], [0], [0], [1], [0, 0, 1, 1], [], []>} : vector<64x7xf32>, vector<7x128xf32>, vector<64x128xf32> -> vector<64x128xf32>
    %c0_6 = arith.constant 0 : index
    %c0_7 = arith.constant 0 : index
    %5 = vector.load %arg5[%c0_6, %c0_7] : memref<1x128xf32, #tpu.memory_space<vmem>>, vector<1x128xf32>
    %6 = vector.broadcast %5 : vector<1x128xf32> to vector<64x128xf32>
    %7 = arith.addf %4, %6 : vector<64x128xf32>
    %cst_8 = arith.constant 0.000000e+00 : f32
    %8 = vector.broadcast %cst_8 : f32 to vector<8x32xf32>
    %cst_9 = arith.constant 0.000000e+00 : f32
    %9 = vector.broadcast %cst_9 : f32 to vector<8x32xf32>
    %10 = vector.extract_strided_slice %7 {offsets = [0, 0], sizes = [8, 128], strides = [1, 1]} : vector<64x128xf32> to vector<8x128xf32>
    %cst_10 = arith.constant dense<0.000000e+00> : vector<8x128xf32>
    %11 = tpu.matmul %8, %1, %cst_10 {dimension_numbers = #tpu.dot_dimension_numbers<[1], [0], [0], [1], [0, 0, 1, 1], [], []>} : vector<8x32xf32>, vector<32x128xf32>, vector<8x128xf32> -> vector<8x128xf32>
    %12 = arith.addf %10, %11 : vector<8x128xf32>
    %13 = vector.extract_strided_slice %12 {offsets = [0, 0], sizes = [8, 32], strides = [1, 1]} : vector<8x128xf32> to vector<8x32xf32>
    %14 = arith.negf %13 : vector<8x32xf32>
    %15 = math.exp %14 : vector<8x32xf32>
    %cst_11 = arith.constant 1.000000e+00 : f32
    %16 = vector.broadcast %cst_11 : f32 to vector<8x32xf32>
    %17 = arith.addf %16, %15 : vector<8x32xf32>
    %18 = arith.divf %16, %17 : vector<8x32xf32>
    %19 = vector.extract_strided_slice %12 {offsets = [0, 32], sizes = [8, 32], strides = [1, 1]} : vector<8x128xf32> to vector<8x32xf32>
    %20 = arith.negf %19 : vector<8x32xf32>
    %21 = math.exp %20 : vector<8x32xf32>
    %cst_12 = arith.constant 1.000000e+00 : f32
    %22 = vector.broadcast %cst_12 : f32 to vector<8x32xf32>
    %23 = arith.addf %22, %21 : vector<8x32xf32>
    %24 = arith.divf %22, %23 : vector<8x32xf32>
    %25 = vector.extract_strided_slice %12 {offsets = [0, 64], sizes = [8, 32], strides = [1, 1]} : vector<8x128xf32> to vector<8x32xf32>
    %26 = math.tanh %25 : vector<8x32xf32>
    %27 = vector.extract_strided_slice %12 {offsets = [0, 96], sizes = [8, 32], strides = [1, 1]} : vector<8x128xf32> to vector<8x32xf32>
    %28 = arith.negf %27 : vector<8x32xf32>
    %29 = math.exp %28 : vector<8x32xf32>
    %cst_13 = arith.constant 1.000000e+00 : f32
    %30 = vector.broadcast %cst_13 : f32 to vector<8x32xf32>
    %31 = arith.addf %30, %29 : vector<8x32xf32>
    %32 = arith.divf %30, %31 : vector<8x32xf32>
    %33 = arith.mulf %24, %9 : vector<8x32xf32>
    %34 = arith.mulf %18, %26 : vector<8x32xf32>
    %35 = arith.addf %33, %34 : vector<8x32xf32>
    %36 = math.tanh %35 : vector<8x32xf32>
    %37 = arith.mulf %32, %36 : vector<8x32xf32>
    %38 = vector.extract_strided_slice %7 {offsets = [8, 0], sizes = [8, 128], strides = [1, 1]} : vector<64x128xf32> to vector<8x128xf32>
    %cst_14 = arith.constant dense<0.000000e+00> : vector<8x128xf32>
    %39 = tpu.matmul %37, %1, %cst_14 {dimension_numbers = #tpu.dot_dimension_numbers<[1], [0], [0], [1], [0, 0, 1, 1], [], []>} : vector<8x32xf32>, vector<32x128xf32>, vector<8x128xf32> -> vector<8x128xf32>
    %40 = arith.addf %38, %39 : vector<8x128xf32>
    %41 = vector.extract_strided_slice %40 {offsets = [0, 0], sizes = [8, 32], strides = [1, 1]} : vector<8x128xf32> to vector<8x32xf32>
    %42 = arith.negf %41 : vector<8x32xf32>
    %43 = math.exp %42 : vector<8x32xf32>
    %cst_15 = arith.constant 1.000000e+00 : f32
    %44 = vector.broadcast %cst_15 : f32 to vector<8x32xf32>
    %45 = arith.addf %44, %43 : vector<8x32xf32>
    %46 = arith.divf %44, %45 : vector<8x32xf32>
    %47 = vector.extract_strided_slice %40 {offsets = [0, 32], sizes = [8, 32], strides = [1, 1]} : vector<8x128xf32> to vector<8x32xf32>
    %48 = arith.negf %47 : vector<8x32xf32>
    %49 = math.exp %48 : vector<8x32xf32>
    %cst_16 = arith.constant 1.000000e+00 : f32
    %50 = vector.broadcast %cst_16 : f32 to vector<8x32xf32>
    %51 = arith.addf %50, %49 : vector<8x32xf32>
    %52 = arith.divf %50, %51 : vector<8x32xf32>
    %53 = vector.extract_strided_slice %40 {offsets = [0, 64], sizes = [8, 32], strides = [1, 1]} : vector<8x128xf32> to vector<8x32xf32>
    %54 = math.tanh %53 : vector<8x32xf32>
    %55 = vector.extract_strided_slice %40 {offsets = [0, 96], sizes = [8, 32], strides = [1, 1]} : vector<8x128xf32> to vector<8x32xf32>
    %56 = arith.negf %55 : vector<8x32xf32>
    %57 = math.exp %56 : vector<8x32xf32>
    %cst_17 = arith.constant 1.000000e+00 : f32
    %58 = vector.broadcast %cst_17 : f32 to vector<8x32xf32>
    %59 = arith.addf %58, %57 : vector<8x32xf32>
    %60 = arith.divf %58, %59 : vector<8x32xf32>
    %61 = arith.mulf %52, %35 : vector<8x32xf32>
    %62 = arith.mulf %46, %54 : vector<8x32xf32>
    %63 = arith.addf %61, %62 : vector<8x32xf32>
    %64 = math.tanh %63 : vector<8x32xf32>
    %65 = arith.mulf %60, %64 : vector<8x32xf32>
    %66 = vector.extract_strided_slice %7 {offsets = [16, 0], sizes = [8, 128], strides = [1, 1]} : vector<64x128xf32> to vector<8x128xf32>
    %cst_18 = arith.constant dense<0.000000e+00> : vector<8x128xf32>
    %67 = tpu.matmul %65, %1, %cst_18 {dimension_numbers = #tpu.dot_dimension_numbers<[1], [0], [0], [1], [0, 0, 1, 1], [], []>} : vector<8x32xf32>, vector<32x128xf32>, vector<8x128xf32> -> vector<8x128xf32>
    %68 = arith.addf %66, %67 : vector<8x128xf32>
    %69 = vector.extract_strided_slice %68 {offsets = [0, 0], sizes = [8, 32], strides = [1, 1]} : vector<8x128xf32> to vector<8x32xf32>
    %70 = arith.negf %69 : vector<8x32xf32>
    %71 = math.exp %70 : vector<8x32xf32>
    %cst_19 = arith.constant 1.000000e+00 : f32
    %72 = vector.broadcast %cst_19 : f32 to vector<8x32xf32>
    %73 = arith.addf %72, %71 : vector<8x32xf32>
    %74 = arith.divf %72, %73 : vector<8x32xf32>
    %75 = vector.extract_strided_slice %68 {offsets = [0, 32], sizes = [8, 32], strides = [1, 1]} : vector<8x128xf32> to vector<8x32xf32>
    %76 = arith.negf %75 : vector<8x32xf32>
    %77 = math.exp %76 : vector<8x32xf32>
    %cst_20 = arith.constant 1.000000e+00 : f32
    %78 = vector.broadcast %cst_20 : f32 to vector<8x32xf32>
    %79 = arith.addf %78, %77 : vector<8x32xf32>
    %80 = arith.divf %78, %79 : vector<8x32xf32>
    %81 = vector.extract_strided_slice %68 {offsets = [0, 64], sizes = [8, 32], strides = [1, 1]} : vector<8x128xf32> to vector<8x32xf32>
    %82 = math.tanh %81 : vector<8x32xf32>
    %83 = vector.extract_strided_slice %68 {offsets = [0, 96], sizes = [8, 32], strides = [1, 1]} : vector<8x128xf32> to vector<8x32xf32>
    %84 = arith.negf %83 : vector<8x32xf32>
    %85 = math.exp %84 : vector<8x32xf32>
    %cst_21 = arith.constant 1.000000e+00 : f32
    %86 = vector.broadcast %cst_21 : f32 to vector<8x32xf32>
    %87 = arith.addf %86, %85 : vector<8x32xf32>
    %88 = arith.divf %86, %87 : vector<8x32xf32>
    %89 = arith.mulf %80, %63 : vector<8x32xf32>
    %90 = arith.mulf %74, %82 : vector<8x32xf32>
    %91 = arith.addf %89, %90 : vector<8x32xf32>
    %92 = math.tanh %91 : vector<8x32xf32>
    %93 = arith.mulf %88, %92 : vector<8x32xf32>
    %94 = vector.extract_strided_slice %7 {offsets = [24, 0], sizes = [8, 128], strides = [1, 1]} : vector<64x128xf32> to vector<8x128xf32>
    %cst_22 = arith.constant dense<0.000000e+00> : vector<8x128xf32>
    %95 = tpu.matmul %93, %1, %cst_22 {dimension_numbers = #tpu.dot_dimension_numbers<[1], [0], [0], [1], [0, 0, 1, 1], [], []>} : vector<8x32xf32>, vector<32x128xf32>, vector<8x128xf32> -> vector<8x128xf32>
    %96 = arith.addf %94, %95 : vector<8x128xf32>
    %97 = vector.extract_strided_slice %96 {offsets = [0, 0], sizes = [8, 32], strides = [1, 1]} : vector<8x128xf32> to vector<8x32xf32>
    %98 = arith.negf %97 : vector<8x32xf32>
    %99 = math.exp %98 : vector<8x32xf32>
    %cst_23 = arith.constant 1.000000e+00 : f32
    %100 = vector.broadcast %cst_23 : f32 to vector<8x32xf32>
    %101 = arith.addf %100, %99 : vector<8x32xf32>
    %102 = arith.divf %100, %101 : vector<8x32xf32>
    %103 = vector.extract_strided_slice %96 {offsets = [0, 32], sizes = [8, 32], strides = [1, 1]} : vector<8x128xf32> to vector<8x32xf32>
    %104 = arith.negf %103 : vector<8x32xf32>
    %105 = math.exp %104 : vector<8x32xf32>
    %cst_24 = arith.constant 1.000000e+00 : f32
    %106 = vector.broadcast %cst_24 : f32 to vector<8x32xf32>
    %107 = arith.addf %106, %105 : vector<8x32xf32>
    %108 = arith.divf %106, %107 : vector<8x32xf32>
    %109 = vector.extract_strided_slice %96 {offsets = [0, 64], sizes = [8, 32], strides = [1, 1]} : vector<8x128xf32> to vector<8x32xf32>
    %110 = math.tanh %109 : vector<8x32xf32>
    %111 = vector.extract_strided_slice %96 {offsets = [0, 96], sizes = [8, 32], strides = [1, 1]} : vector<8x128xf32> to vector<8x32xf32>
    %112 = arith.negf %111 : vector<8x32xf32>
    %113 = math.exp %112 : vector<8x32xf32>
    %cst_25 = arith.constant 1.000000e+00 : f32
    %114 = vector.broadcast %cst_25 : f32 to vector<8x32xf32>
    %115 = arith.addf %114, %113 : vector<8x32xf32>
    %116 = arith.divf %114, %115 : vector<8x32xf32>
    %117 = arith.mulf %108, %91 : vector<8x32xf32>
    %118 = arith.mulf %102, %110 : vector<8x32xf32>
    %119 = arith.addf %117, %118 : vector<8x32xf32>
    %120 = math.tanh %119 : vector<8x32xf32>
    %121 = arith.mulf %116, %120 : vector<8x32xf32>
    %122 = vector.extract_strided_slice %7 {offsets = [32, 0], sizes = [8, 128], strides = [1, 1]} : vector<64x128xf32> to vector<8x128xf32>
    %cst_26 = arith.constant dense<0.000000e+00> : vector<8x128xf32>
    %123 = tpu.matmul %121, %1, %cst_26 {dimension_numbers = #tpu.dot_dimension_numbers<[1], [0], [0], [1], [0, 0, 1, 1], [], []>} : vector<8x32xf32>, vector<32x128xf32>, vector<8x128xf32> -> vector<8x128xf32>
    %124 = arith.addf %122, %123 : vector<8x128xf32>
    %125 = vector.extract_strided_slice %124 {offsets = [0, 0], sizes = [8, 32], strides = [1, 1]} : vector<8x128xf32> to vector<8x32xf32>
    %126 = arith.negf %125 : vector<8x32xf32>
    %127 = math.exp %126 : vector<8x32xf32>
    %cst_27 = arith.constant 1.000000e+00 : f32
    %128 = vector.broadcast %cst_27 : f32 to vector<8x32xf32>
    %129 = arith.addf %128, %127 : vector<8x32xf32>
    %130 = arith.divf %128, %129 : vector<8x32xf32>
    %131 = vector.extract_strided_slice %124 {offsets = [0, 32], sizes = [8, 32], strides = [1, 1]} : vector<8x128xf32> to vector<8x32xf32>
    %132 = arith.negf %131 : vector<8x32xf32>
    %133 = math.exp %132 : vector<8x32xf32>
    %cst_28 = arith.constant 1.000000e+00 : f32
    %134 = vector.broadcast %cst_28 : f32 to vector<8x32xf32>
    %135 = arith.addf %134, %133 : vector<8x32xf32>
    %136 = arith.divf %134, %135 : vector<8x32xf32>
    %137 = vector.extract_strided_slice %124 {offsets = [0, 64], sizes = [8, 32], strides = [1, 1]} : vector<8x128xf32> to vector<8x32xf32>
    %138 = math.tanh %137 : vector<8x32xf32>
    %139 = vector.extract_strided_slice %124 {offsets = [0, 96], sizes = [8, 32], strides = [1, 1]} : vector<8x128xf32> to vector<8x32xf32>
    %140 = arith.negf %139 : vector<8x32xf32>
    %141 = math.exp %140 : vector<8x32xf32>
    %cst_29 = arith.constant 1.000000e+00 : f32
    %142 = vector.broadcast %cst_29 : f32 to vector<8x32xf32>
    %143 = arith.addf %142, %141 : vector<8x32xf32>
    %144 = arith.divf %142, %143 : vector<8x32xf32>
    %145 = arith.mulf %136, %119 : vector<8x32xf32>
    %146 = arith.mulf %130, %138 : vector<8x32xf32>
    %147 = arith.addf %145, %146 : vector<8x32xf32>
    %148 = math.tanh %147 : vector<8x32xf32>
    %149 = arith.mulf %144, %148 : vector<8x32xf32>
    %150 = vector.extract_strided_slice %7 {offsets = [40, 0], sizes = [8, 128], strides = [1, 1]} : vector<64x128xf32> to vector<8x128xf32>
    %cst_30 = arith.constant dense<0.000000e+00> : vector<8x128xf32>
    %151 = tpu.matmul %149, %1, %cst_30 {dimension_numbers = #tpu.dot_dimension_numbers<[1], [0], [0], [1], [0, 0, 1, 1], [], []>} : vector<8x32xf32>, vector<32x128xf32>, vector<8x128xf32> -> vector<8x128xf32>
    %152 = arith.addf %150, %151 : vector<8x128xf32>
    %153 = vector.extract_strided_slice %152 {offsets = [0, 0], sizes = [8, 32], strides = [1, 1]} : vector<8x128xf32> to vector<8x32xf32>
    %154 = arith.negf %153 : vector<8x32xf32>
    %155 = math.exp %154 : vector<8x32xf32>
    %cst_31 = arith.constant 1.000000e+00 : f32
    %156 = vector.broadcast %cst_31 : f32 to vector<8x32xf32>
    %157 = arith.addf %156, %155 : vector<8x32xf32>
    %158 = arith.divf %156, %157 : vector<8x32xf32>
    %159 = vector.extract_strided_slice %152 {offsets = [0, 32], sizes = [8, 32], strides = [1, 1]} : vector<8x128xf32> to vector<8x32xf32>
    %160 = arith.negf %159 : vector<8x32xf32>
    %161 = math.exp %160 : vector<8x32xf32>
    %cst_32 = arith.constant 1.000000e+00 : f32
    %162 = vector.broadcast %cst_32 : f32 to vector<8x32xf32>
    %163 = arith.addf %162, %161 : vector<8x32xf32>
    %164 = arith.divf %162, %163 : vector<8x32xf32>
    %165 = vector.extract_strided_slice %152 {offsets = [0, 64], sizes = [8, 32], strides = [1, 1]} : vector<8x128xf32> to vector<8x32xf32>
    %166 = math.tanh %165 : vector<8x32xf32>
    %167 = vector.extract_strided_slice %152 {offsets = [0, 96], sizes = [8, 32], strides = [1, 1]} : vector<8x128xf32> to vector<8x32xf32>
    %168 = arith.negf %167 : vector<8x32xf32>
    %169 = math.exp %168 : vector<8x32xf32>
    %cst_33 = arith.constant 1.000000e+00 : f32
    %170 = vector.broadcast %cst_33 : f32 to vector<8x32xf32>
    %171 = arith.addf %170, %169 : vector<8x32xf32>
    %172 = arith.divf %170, %171 : vector<8x32xf32>
    %173 = arith.mulf %164, %147 : vector<8x32xf32>
    %174 = arith.mulf %158, %166 : vector<8x32xf32>
    %175 = arith.addf %173, %174 : vector<8x32xf32>
    %176 = math.tanh %175 : vector<8x32xf32>
    %177 = arith.mulf %172, %176 : vector<8x32xf32>
    %178 = vector.extract_strided_slice %7 {offsets = [48, 0], sizes = [8, 128], strides = [1, 1]} : vector<64x128xf32> to vector<8x128xf32>
    %cst_34 = arith.constant dense<0.000000e+00> : vector<8x128xf32>
    %179 = tpu.matmul %177, %1, %cst_34 {dimension_numbers = #tpu.dot_dimension_numbers<[1], [0], [0], [1], [0, 0, 1, 1], [], []>} : vector<8x32xf32>, vector<32x128xf32>, vector<8x128xf32> -> vector<8x128xf32>
    %180 = arith.addf %178, %179 : vector<8x128xf32>
    %181 = vector.extract_strided_slice %180 {offsets = [0, 0], sizes = [8, 32], strides = [1, 1]} : vector<8x128xf32> to vector<8x32xf32>
    %182 = arith.negf %181 : vector<8x32xf32>
    %183 = math.exp %182 : vector<8x32xf32>
    %cst_35 = arith.constant 1.000000e+00 : f32
    %184 = vector.broadcast %cst_35 : f32 to vector<8x32xf32>
    %185 = arith.addf %184, %183 : vector<8x32xf32>
    %186 = arith.divf %184, %185 : vector<8x32xf32>
    %187 = vector.extract_strided_slice %180 {offsets = [0, 32], sizes = [8, 32], strides = [1, 1]} : vector<8x128xf32> to vector<8x32xf32>
    %188 = arith.negf %187 : vector<8x32xf32>
    %189 = math.exp %188 : vector<8x32xf32>
    %cst_36 = arith.constant 1.000000e+00 : f32
    %190 = vector.broadcast %cst_36 : f32 to vector<8x32xf32>
    %191 = arith.addf %190, %189 : vector<8x32xf32>
    %192 = arith.divf %190, %191 : vector<8x32xf32>
    %193 = vector.extract_strided_slice %180 {offsets = [0, 64], sizes = [8, 32], strides = [1, 1]} : vector<8x128xf32> to vector<8x32xf32>
    %194 = math.tanh %193 : vector<8x32xf32>
    %195 = vector.extract_strided_slice %180 {offsets = [0, 96], sizes = [8, 32], strides = [1, 1]} : vector<8x128xf32> to vector<8x32xf32>
    %196 = arith.negf %195 : vector<8x32xf32>
    %197 = math.exp %196 : vector<8x32xf32>
    %cst_37 = arith.constant 1.000000e+00 : f32
    %198 = vector.broadcast %cst_37 : f32 to vector<8x32xf32>
    %199 = arith.addf %198, %197 : vector<8x32xf32>
    %200 = arith.divf %198, %199 : vector<8x32xf32>
    %201 = arith.mulf %192, %175 : vector<8x32xf32>
    %202 = arith.mulf %186, %194 : vector<8x32xf32>
    %203 = arith.addf %201, %202 : vector<8x32xf32>
    %204 = math.tanh %203 : vector<8x32xf32>
    %205 = arith.mulf %200, %204 : vector<8x32xf32>
    %206 = vector.extract_strided_slice %7 {offsets = [56, 0], sizes = [8, 128], strides = [1, 1]} : vector<64x128xf32> to vector<8x128xf32>
    %cst_38 = arith.constant dense<0.000000e+00> : vector<8x128xf32>
    %207 = tpu.matmul %205, %1, %cst_38 {dimension_numbers = #tpu.dot_dimension_numbers<[1], [0], [0], [1], [0, 0, 1, 1], [], []>} : vector<8x32xf32>, vector<32x128xf32>, vector<8x128xf32> -> vector<8x128xf32>
    %208 = arith.addf %206, %207 : vector<8x128xf32>
    %209 = vector.extract_strided_slice %208 {offsets = [0, 0], sizes = [8, 32], strides = [1, 1]} : vector<8x128xf32> to vector<8x32xf32>
    %210 = arith.negf %209 : vector<8x32xf32>
    %211 = math.exp %210 : vector<8x32xf32>
    %cst_39 = arith.constant 1.000000e+00 : f32
    %212 = vector.broadcast %cst_39 : f32 to vector<8x32xf32>
    %213 = arith.addf %212, %211 : vector<8x32xf32>
    %214 = arith.divf %212, %213 : vector<8x32xf32>
    %215 = vector.extract_strided_slice %208 {offsets = [0, 32], sizes = [8, 32], strides = [1, 1]} : vector<8x128xf32> to vector<8x32xf32>
    %216 = arith.negf %215 : vector<8x32xf32>
    %217 = math.exp %216 : vector<8x32xf32>
    %cst_40 = arith.constant 1.000000e+00 : f32
    %218 = vector.broadcast %cst_40 : f32 to vector<8x32xf32>
    %219 = arith.addf %218, %217 : vector<8x32xf32>
    %220 = arith.divf %218, %219 : vector<8x32xf32>
    %221 = vector.extract_strided_slice %208 {offsets = [0, 64], sizes = [8, 32], strides = [1, 1]} : vector<8x128xf32> to vector<8x32xf32>
    %222 = math.tanh %221 : vector<8x32xf32>
    %223 = vector.extract_strided_slice %208 {offsets = [0, 96], sizes = [8, 32], strides = [1, 1]} : vector<8x128xf32> to vector<8x32xf32>
    %224 = arith.negf %223 : vector<8x32xf32>
    %225 = math.exp %224 : vector<8x32xf32>
    %cst_41 = arith.constant 1.000000e+00 : f32
    %226 = vector.broadcast %cst_41 : f32 to vector<8x32xf32>
    %227 = arith.addf %226, %225 : vector<8x32xf32>
    %228 = arith.divf %226, %227 : vector<8x32xf32>
    %229 = arith.mulf %220, %203 : vector<8x32xf32>
    %230 = arith.mulf %214, %222 : vector<8x32xf32>
    %231 = arith.addf %229, %230 : vector<8x32xf32>
    %232 = math.tanh %231 : vector<8x32xf32>
    %233 = arith.mulf %228, %232 : vector<8x32xf32>
    %c0_42 = arith.constant 0 : index
    %c0_43 = arith.constant 0 : index
    %234 = vector.load %arg6[%c0_42, %c0_43] : memref<1x128xf32, #tpu.memory_space<vmem>>, vector<1x128xf32>
    %c0_44 = arith.constant 0 : index
    %c0_45 = arith.constant 0 : index
    %235 = vector.load %arg7[%c0_44, %c0_45] : memref<32x128xf32, #tpu.memory_space<vmem>>, vector<32x128xf32>
    %c0_46 = arith.constant 0 : index
    %c0_47 = arith.constant 0 : index
    %236 = vector.load %arg8[%c0_46, %c0_47] : memref<1x128xf32, #tpu.memory_space<vmem>>, vector<1x128xf32>
    %237 = vector.shape_cast %236 : vector<1x128xf32> to vector<1x128xf32>
    %238 = vector.broadcast %237 : vector<1x128xf32> to vector<8x128xf32>
    %c0_48 = arith.constant 0 : index
    %c0_49 = arith.constant 0 : index
    %239 = vector.load %arg9[%c0_48, %c0_49] : memref<1x32xf32, #tpu.memory_space<vmem>>, vector<1x32xf32>
    %c0_50 = arith.constant 0 : index
    %c0_51 = arith.constant 0 : index
    %240 = vector.load %arg10[%c0_50, %c0_51] : memref<1x1xf32, #tpu.memory_space<vmem>>, vector<1x1xf32>
    %c0_52 = arith.constant 0 : index
    %c0_53 = arith.constant 0 : index
    %241 = vector.load %arg1[%c0_52, %c0_53] : memref<8x4xf32, #tpu.memory_space<vmem>>, vector<8x4xf32>
    %242 = vector.extract_strided_slice %0 {offsets = [7, 0, 6], sizes = [1, 8, 1], strides = [1, 1, 1]} : vector<8x8x7xf32> to vector<1x8x1xf32>
    %243 = vector.shape_cast %242 : vector<1x8x1xf32> to vector<8x1xf32>
    %244 = vector.broadcast %243 : vector<8x1xf32> to vector<8x128xf32>
    %245 = vector.broadcast %234 : vector<1x128xf32> to vector<8x128xf32>
    %246 = arith.mulf %244, %245 : vector<8x128xf32>
    %cst_54 = arith.constant dense<0.000000e+00> : vector<8x128xf32>
    %247 = tpu.matmul %233, %235, %cst_54 {dimension_numbers = #tpu.dot_dimension_numbers<[1], [0], [0], [1], [0, 0, 1, 1], [], []>} : vector<8x32xf32>, vector<32x128xf32>, vector<8x128xf32> -> vector<8x128xf32>
    %248 = arith.addf %246, %247 : vector<8x128xf32>
    %249 = arith.addf %248, %238 : vector<8x128xf32>
    %250 = vector.extract_strided_slice %249 {offsets = [0, 0], sizes = [8, 32], strides = [1, 1]} : vector<8x128xf32> to vector<8x32xf32>
    %251 = arith.negf %250 : vector<8x32xf32>
    %252 = math.exp %251 : vector<8x32xf32>
    %cst_55 = arith.constant 1.000000e+00 : f32
    %253 = vector.broadcast %cst_55 : f32 to vector<8x32xf32>
    %254 = arith.addf %253, %252 : vector<8x32xf32>
    %255 = arith.divf %253, %254 : vector<8x32xf32>
    %256 = vector.extract_strided_slice %249 {offsets = [0, 32], sizes = [8, 32], strides = [1, 1]} : vector<8x128xf32> to vector<8x32xf32>
    %257 = arith.negf %256 : vector<8x32xf32>
    %258 = math.exp %257 : vector<8x32xf32>
    %cst_56 = arith.constant 1.000000e+00 : f32
    %259 = vector.broadcast %cst_56 : f32 to vector<8x32xf32>
    %260 = arith.addf %259, %258 : vector<8x32xf32>
    %261 = arith.divf %259, %260 : vector<8x32xf32>
    %262 = vector.extract_strided_slice %249 {offsets = [0, 64], sizes = [8, 32], strides = [1, 1]} : vector<8x128xf32> to vector<8x32xf32>
    %263 = math.tanh %262 : vector<8x32xf32>
    %264 = vector.extract_strided_slice %249 {offsets = [0, 96], sizes = [8, 32], strides = [1, 1]} : vector<8x128xf32> to vector<8x32xf32>
    %265 = arith.negf %264 : vector<8x32xf32>
    %266 = math.exp %265 : vector<8x32xf32>
    %cst_57 = arith.constant 1.000000e+00 : f32
    %267 = vector.broadcast %cst_57 : f32 to vector<8x32xf32>
    %268 = arith.addf %267, %266 : vector<8x32xf32>
    %269 = arith.divf %267, %268 : vector<8x32xf32>
    %270 = arith.mulf %261, %231 : vector<8x32xf32>
    %271 = arith.mulf %255, %263 : vector<8x32xf32>
    %272 = arith.addf %270, %271 : vector<8x32xf32>
    %273 = math.tanh %272 : vector<8x32xf32>
    %274 = arith.mulf %269, %273 : vector<8x32xf32>
    %275 = vector.broadcast %239 : vector<1x32xf32> to vector<8x32xf32>
    %276 = arith.mulf %274, %275 : vector<8x32xf32>
    %cst_58 = arith.constant dense<0.000000e+00> : vector<8xf32>
    %277 = vector.multi_reduction <add>, %276, %cst_58 [1] : vector<8x32xf32> to vector<8xf32>
    %278 = vector.shape_cast %277 : vector<8xf32> to vector<8x1xf32>
    %279 = vector.broadcast %240 : vector<1x1xf32> to vector<8x1xf32>
    %280 = arith.addf %278, %279 : vector<8x1xf32>
    %c0_59 = arith.constant 0 : index
    %281 = memref.load %arg2[%c0_59] : memref<4xi32, #tpu.memory_space<smem>>
    %c0_i32 = arith.constant 0 : i32
    %282 = arith.cmpi sgt, %281, %c0_i32 : i32
    %283 = vector.extract_strided_slice %241 {offsets = [0, 0], sizes = [8, 1], strides = [1, 1]} : vector<8x4xf32> to vector<8x1xf32>
    %284 = arith.select %282, %283, %280 : vector<8x1xf32>
    %285 = vector.broadcast %284 : vector<8x1xf32> to vector<8x128xf32>
    %286 = vector.broadcast %234 : vector<1x128xf32> to vector<8x128xf32>
    %287 = arith.mulf %285, %286 : vector<8x128xf32>
    %cst_60 = arith.constant dense<0.000000e+00> : vector<8x128xf32>
    %288 = tpu.matmul %274, %235, %cst_60 {dimension_numbers = #tpu.dot_dimension_numbers<[1], [0], [0], [1], [0, 0, 1, 1], [], []>} : vector<8x32xf32>, vector<32x128xf32>, vector<8x128xf32> -> vector<8x128xf32>
    %289 = arith.addf %287, %288 : vector<8x128xf32>
    %290 = arith.addf %289, %238 : vector<8x128xf32>
    %291 = vector.extract_strided_slice %290 {offsets = [0, 0], sizes = [8, 32], strides = [1, 1]} : vector<8x128xf32> to vector<8x32xf32>
    %292 = arith.negf %291 : vector<8x32xf32>
    %293 = math.exp %292 : vector<8x32xf32>
    %cst_61 = arith.constant 1.000000e+00 : f32
    %294 = vector.broadcast %cst_61 : f32 to vector<8x32xf32>
    %295 = arith.addf %294, %293 : vector<8x32xf32>
    %296 = arith.divf %294, %295 : vector<8x32xf32>
    %297 = vector.extract_strided_slice %290 {offsets = [0, 32], sizes = [8, 32], strides = [1, 1]} : vector<8x128xf32> to vector<8x32xf32>
    %298 = arith.negf %297 : vector<8x32xf32>
    %299 = math.exp %298 : vector<8x32xf32>
    %cst_62 = arith.constant 1.000000e+00 : f32
    %300 = vector.broadcast %cst_62 : f32 to vector<8x32xf32>
    %301 = arith.addf %300, %299 : vector<8x32xf32>
    %302 = arith.divf %300, %301 : vector<8x32xf32>
    %303 = vector.extract_strided_slice %290 {offsets = [0, 64], sizes = [8, 32], strides = [1, 1]} : vector<8x128xf32> to vector<8x32xf32>
    %304 = math.tanh %303 : vector<8x32xf32>
    %305 = vector.extract_strided_slice %290 {offsets = [0, 96], sizes = [8, 32], strides = [1, 1]} : vector<8x128xf32> to vector<8x32xf32>
    %306 = arith.negf %305 : vector<8x32xf32>
    %307 = math.exp %306 : vector<8x32xf32>
    %cst_63 = arith.constant 1.000000e+00 : f32
    %308 = vector.broadcast %cst_63 : f32 to vector<8x32xf32>
    %309 = arith.addf %308, %307 : vector<8x32xf32>
    %310 = arith.divf %308, %309 : vector<8x32xf32>
    %311 = arith.mulf %302, %272 : vector<8x32xf32>
    %312 = arith.mulf %296, %304 : vector<8x32xf32>
    %313 = arith.addf %311, %312 : vector<8x32xf32>
    %314 = math.tanh %313 : vector<8x32xf32>
    %315 = arith.mulf %310, %314 : vector<8x32xf32>
    %316 = vector.broadcast %239 : vector<1x32xf32> to vector<8x32xf32>
    %317 = arith.mulf %315, %316 : vector<8x32xf32>
    %cst_64 = arith.constant dense<0.000000e+00> : vector<8xf32>
    %318 = vector.multi_reduction <add>, %317, %cst_64 [1] : vector<8x32xf32> to vector<8xf32>
    %319 = vector.shape_cast %318 : vector<8xf32> to vector<8x1xf32>
    %320 = vector.broadcast %240 : vector<1x1xf32> to vector<8x1xf32>
    %321 = arith.addf %319, %320 : vector<8x1xf32>
    %c1 = arith.constant 1 : index
    %322 = memref.load %arg2[%c1] : memref<4xi32, #tpu.memory_space<smem>>
    %c0_i32_65 = arith.constant 0 : i32
    %323 = arith.cmpi sgt, %322, %c0_i32_65 : i32
    %324 = vector.extract_strided_slice %241 {offsets = [0, 1], sizes = [8, 1], strides = [1, 1]} : vector<8x4xf32> to vector<8x1xf32>
    %325 = arith.select %323, %324, %321 : vector<8x1xf32>
    %326 = vector.broadcast %325 : vector<8x1xf32> to vector<8x128xf32>
    %327 = vector.broadcast %234 : vector<1x128xf32> to vector<8x128xf32>
    %328 = arith.mulf %326, %327 : vector<8x128xf32>
    %cst_66 = arith.constant dense<0.000000e+00> : vector<8x128xf32>
    %329 = tpu.matmul %315, %235, %cst_66 {dimension_numbers = #tpu.dot_dimension_numbers<[1], [0], [0], [1], [0, 0, 1, 1], [], []>} : vector<8x32xf32>, vector<32x128xf32>, vector<8x128xf32> -> vector<8x128xf32>
    %330 = arith.addf %328, %329 : vector<8x128xf32>
    %331 = arith.addf %330, %238 : vector<8x128xf32>
    %332 = vector.extract_strided_slice %331 {offsets = [0, 0], sizes = [8, 32], strides = [1, 1]} : vector<8x128xf32> to vector<8x32xf32>
    %333 = arith.negf %332 : vector<8x32xf32>
    %334 = math.exp %333 : vector<8x32xf32>
    %cst_67 = arith.constant 1.000000e+00 : f32
    %335 = vector.broadcast %cst_67 : f32 to vector<8x32xf32>
    %336 = arith.addf %335, %334 : vector<8x32xf32>
    %337 = arith.divf %335, %336 : vector<8x32xf32>
    %338 = vector.extract_strided_slice %331 {offsets = [0, 32], sizes = [8, 32], strides = [1, 1]} : vector<8x128xf32> to vector<8x32xf32>
    %339 = arith.negf %338 : vector<8x32xf32>
    %340 = math.exp %339 : vector<8x32xf32>
    %cst_68 = arith.constant 1.000000e+00 : f32
    %341 = vector.broadcast %cst_68 : f32 to vector<8x32xf32>
    %342 = arith.addf %341, %340 : vector<8x32xf32>
    %343 = arith.divf %341, %342 : vector<8x32xf32>
    %344 = vector.extract_strided_slice %331 {offsets = [0, 64], sizes = [8, 32], strides = [1, 1]} : vector<8x128xf32> to vector<8x32xf32>
    %345 = math.tanh %344 : vector<8x32xf32>
    %346 = vector.extract_strided_slice %331 {offsets = [0, 96], sizes = [8, 32], strides = [1, 1]} : vector<8x128xf32> to vector<8x32xf32>
    %347 = arith.negf %346 : vector<8x32xf32>
    %348 = math.exp %347 : vector<8x32xf32>
    %cst_69 = arith.constant 1.000000e+00 : f32
    %349 = vector.broadcast %cst_69 : f32 to vector<8x32xf32>
    %350 = arith.addf %349, %348 : vector<8x32xf32>
    %351 = arith.divf %349, %350 : vector<8x32xf32>
    %352 = arith.mulf %343, %313 : vector<8x32xf32>
    %353 = arith.mulf %337, %345 : vector<8x32xf32>
    %354 = arith.addf %352, %353 : vector<8x32xf32>
    %355 = math.tanh %354 : vector<8x32xf32>
    %356 = arith.mulf %351, %355 : vector<8x32xf32>
    %357 = vector.broadcast %239 : vector<1x32xf32> to vector<8x32xf32>
    %358 = arith.mulf %356, %357 : vector<8x32xf32>
    %cst_70 = arith.constant dense<0.000000e+00> : vector<8xf32>
    %359 = vector.multi_reduction <add>, %358, %cst_70 [1] : vector<8x32xf32> to vector<8xf32>
    %360 = vector.shape_cast %359 : vector<8xf32> to vector<8x1xf32>
    %361 = vector.broadcast %240 : vector<1x1xf32> to vector<8x1xf32>
    %362 = arith.addf %360, %361 : vector<8x1xf32>
    %c2 = arith.constant 2 : index
    %363 = memref.load %arg2[%c2] : memref<4xi32, #tpu.memory_space<smem>>
    %c0_i32_71 = arith.constant 0 : i32
    %364 = arith.cmpi sgt, %363, %c0_i32_71 : i32
    %365 = vector.extract_strided_slice %241 {offsets = [0, 2], sizes = [8, 1], strides = [1, 1]} : vector<8x4xf32> to vector<8x1xf32>
    %366 = arith.select %364, %365, %362 : vector<8x1xf32>
    %367 = vector.broadcast %366 : vector<8x1xf32> to vector<8x128xf32>
    %368 = vector.broadcast %234 : vector<1x128xf32> to vector<8x128xf32>
    %369 = arith.mulf %367, %368 : vector<8x128xf32>
    %cst_72 = arith.constant dense<0.000000e+00> : vector<8x128xf32>
    %370 = tpu.matmul %356, %235, %cst_72 {dimension_numbers = #tpu.dot_dimension_numbers<[1], [0], [0], [1], [0, 0, 1, 1], [], []>} : vector<8x32xf32>, vector<32x128xf32>, vector<8x128xf32> -> vector<8x128xf32>
    %371 = arith.addf %369, %370 : vector<8x128xf32>
    %372 = arith.addf %371, %238 : vector<8x128xf32>
    %373 = vector.extract_strided_slice %372 {offsets = [0, 0], sizes = [8, 32], strides = [1, 1]} : vector<8x128xf32> to vector<8x32xf32>
    %374 = arith.negf %373 : vector<8x32xf32>
    %375 = math.exp %374 : vector<8x32xf32>
    %cst_73 = arith.constant 1.000000e+00 : f32
    %376 = vector.broadcast %cst_73 : f32 to vector<8x32xf32>
    %377 = arith.addf %376, %375 : vector<8x32xf32>
    %378 = arith.divf %376, %377 : vector<8x32xf32>
    %379 = vector.extract_strided_slice %372 {offsets = [0, 32], sizes = [8, 32], strides = [1, 1]} : vector<8x128xf32> to vector<8x32xf32>
    %380 = arith.negf %379 : vector<8x32xf32>
    %381 = math.exp %380 : vector<8x32xf32>
    %cst_74 = arith.constant 1.000000e+00 : f32
    %382 = vector.broadcast %cst_74 : f32 to vector<8x32xf32>
    %383 = arith.addf %382, %381 : vector<8x32xf32>
    %384 = arith.divf %382, %383 : vector<8x32xf32>
    %385 = vector.extract_strided_slice %372 {offsets = [0, 64], sizes = [8, 32], strides = [1, 1]} : vector<8x128xf32> to vector<8x32xf32>
    %386 = math.tanh %385 : vector<8x32xf32>
    %387 = vector.extract_strided_slice %372 {offsets = [0, 96], sizes = [8, 32], strides = [1, 1]} : vector<8x128xf32> to vector<8x32xf32>
    %388 = arith.negf %387 : vector<8x32xf32>
    %389 = math.exp %388 : vector<8x32xf32>
    %cst_75 = arith.constant 1.000000e+00 : f32
    %390 = vector.broadcast %cst_75 : f32 to vector<8x32xf32>
    %391 = arith.addf %390, %389 : vector<8x32xf32>
    %392 = arith.divf %390, %391 : vector<8x32xf32>
    %393 = arith.mulf %384, %354 : vector<8x32xf32>
    %394 = arith.mulf %378, %386 : vector<8x32xf32>
    %395 = arith.addf %393, %394 : vector<8x32xf32>
    %396 = math.tanh %395 : vector<8x32xf32>
    %397 = arith.mulf %392, %396 : vector<8x32xf32>
    %398 = vector.broadcast %239 : vector<1x32xf32> to vector<8x32xf32>
    %399 = arith.mulf %397, %398 : vector<8x32xf32>
    %cst_76 = arith.constant dense<0.000000e+00> : vector<8xf32>
    %400 = vector.multi_reduction <add>, %399, %cst_76 [1] : vector<8x32xf32> to vector<8xf32>
    %401 = vector.shape_cast %400 : vector<8xf32> to vector<8x1xf32>
    %402 = vector.broadcast %240 : vector<1x1xf32> to vector<8x1xf32>
    %403 = arith.addf %401, %402 : vector<8x1xf32>
    %404 = tpu.concatenate %280, %321, %362, %403 in 1 : vector<8x1xf32>, vector<8x1xf32>, vector<8x1xf32>, vector<8x1xf32> -> vector<8x4xf32>
    %c0_77 = arith.constant 0 : index
    %c0_78 = arith.constant 0 : index
    %405 = vector.load %arg11[%c0_77, %c0_78] : memref<8x4xf32, #tpu.memory_space<vmem>>, vector<8x4xf32>
    tpu.vector_store %arg11[%c0_77, %c0_78], %404 {strides = array<i32>} : memref<8x4xf32, #tpu.memory_space<vmem>>, vector<8x4xf32>,
    return
  }
}

</mosaic_0001>

<bundles_post_ra>
// kernel: tpu_custom_call.1
= control target key start
LH: loop header
LB: loop body
LE: loop exit
PB: predicated region body
PF: predicated region fallthrough
CT: control target
= control target key end

     0   :  { %s1512_s0 = inlined_call_operand.vmem [shape: f32[8,8,7], index: 0, kind: input, shape index: {}]   ;;  %s1513_s1 = inlined_call_operand.vmem [shape: f32[8,4], index: 1, kind: input, shape index: {}]   ;;  %s1514_s2 = inlined_call_operand.vmem [shape: s32[4], index: 2, kind: input, shape index: {}]   ;;  %s1515_s3 = inlined_call_operand.vmem [shape: f32[7,128], index: 3, kind: input, shape index: {}]   ;;  %s1516_s4 = inlined_call_operand.vmem [shape: f32[32,128], index: 4, kind: input, shape index: {}]   ;;  %s1517_s5 = inlined_call_operand.vmem [shape: f32[1,128], index: 5, kind: input, shape index: {}]   ;;  %s1518_s6 = inlined_call_operand.vmem [shape: f32[1,128], index: 6, kind: input, shape index: {}]   ;;  %s1519_s7 = inlined_call_operand.vmem [shape: f32[32,128], index: 7, kind: input, shape index: {}]   ;;  %s1520_s8 = inlined_call_operand.vmem [shape: f32[1,128], index: 8, kind: input, shape index: {}]   ;;  %s1521_s9 = inlined_call_operand.vmem [shape: f32[1,32], index: 9, kind: input, shape index: {}]   ;;  %s1522_s10 = inlined_call_operand.<no memory space> [shape: f32[1,1], index: 10, kind: input, shape index: {}]   ;;  %s1523_s11 = inlined_call_operand.vmem [shape: f32[8,4], index: 11, kind: output, shape index: {}]  }
   0x1   :  { %v16_v0 = vstv %s1522_s10 }
   0x2   :  { %17 = vst [vmem:[#allocation2] sm:$0x1] %v16_v0 }
   0x3   :  { %18 = vsyncpa [#allocation4], 0  ;;  %s28_s21 = sshll.u32 %s1514_s2, 4  ;;  %s1190_s22 = smov [#allocation3]   ;;  %s29_s21 = int_to_ptr.vmem [resolvable:$true] %s28_s21 }
   0x4   :  { %31 = dma.vmem_to_smem %s29_s21, 16, %s1190_s22, [#allocation4]  }
   0x5   :  { %1188 = dma.done.wait [#allocation4], 16  }
   0x6   :  { %1189 = vsyncadd [#allocation4], 4294967280 }
   0x7   :  { %52 = sfence }
   0x8   :  { %v65_v1 = vld [vmem:[%s1515_s3] sm:$0x7f]  ;;  %vm95_vm0 = vcmask 1046528   ;;  %v59_v2 = vld [vmem:[%s1512_s0 + $0x30] sm:$0xff]  ;;  %vm70_vm1 = vcmask 56320   ;;  %v1277_v3 = vld [vmem:[%s1516_s4 + $0x18] sm:$0xff] }
   0x9   :  { %1058 = vmatpush.msk.msra.mxu1 %vm95_vm0, %v65_v1  ;;  %1024 = vmatpush.msk.msra.mxu0 %vm95_vm0, %v65_v1  ;;  %v1283_v4 = vld [vmem:[%s1516_s4 + $0x10] sm:$0xff]  ;;  %v53_v5 = vld [vmem:[%s1512_s0] sm:$0xff]  ;;  %v1294_v6 = vld [vmem:[%s1516_s4 + $0x8] sm:$0xff]  ;;  %v1191_v9 = vmov 0.0   ;;  %s1192_s18 = smov 64   ;;  %vm140_vm6 = vcmask 261120  }
   0xa   :  { %1031 = vmatmul.msk.f32.vlgmr.msra.gmra.mxu1 %vm70_vm1, %v59_v2  ;;  %219 = vmatpush.msra.mxu2 %v1277_v3  ;;  %v1302_v7 = vld [vmem:[%s1516_s4] sm:$0xff]  ;;  %v1309_v8 = vld [vmem:[%s1512_s0 + $0x38] sm:$0xff]  ;;  %v54_v39 = vld [vmem:[%s1512_s0 + $0x8] sm:$0xff]  ;;  %s1195_s17 = smov 96   ;;  %s1052_s21 = sld [smem:[#allocation3 + $0x1]] }
   0xb   :  { %156 = vmatpush.msrb.mxu1 %v1277_v3  ;;  %1025 = vmatmul.msk.f32.vlgmr.msra.gmra.mxu0 %vm70_vm1, %v53_v5  ;;  %v1341_v13 = vld [vmem:[%s1517_s5] ss:$0 sm:$0xff]  ;;  %s1193_s5 = smov 32   ;;  %s1199_s23 = smov 2  }
   0xc   :  { %220 = vmatpush.msra.mxu2 %v1283_v4  ;;  %282 = vmatpush.msra.mxu3 %v1277_v3  ;;  %s1055_s24 = sld [smem:[#allocation3 + $0x2]]  ;;  %s1201_s26 = smov 3  }
   0xd   :  { %157 = vmatpush.msrb.mxu1 %v1283_v4 }
   0xe   :  { %221 = vmatpush.msra.mxu2 %v1294_v6  ;;  %283 = vmatpush.msra.mxu3 %v1283_v4 }
   0xf   :  { %158 = vmatpush.msrb.mxu1 %v1294_v6 }
  0x10   :  { %222 = vmatpush.msra.mxu2 %v1302_v7  ;;  %284 = vmatpush.msra.mxu3 %v1294_v6  ;;  %p830_p1 = scmp.gt.s32.totalorder %s1052_s21, 0 }
  0x11   :  { %159 = vmatpush.msrb.mxu1 %v1302_v7 }
  0x12   :  { %408 = vmatpush.msrb.mxu2 %v1277_v3  ;;  %1032 = vmatmul.msk.f32.gmra.mxu1 %vm70_vm1, %v1309_v8  ;;  %s831_s22 = scalar_select %p830_p1, 1, 0 }
  0x13   :  { %285 = vmatpush.msra.mxu3 %v1302_v7  ;;  %345 = vmatpush.msra.mxu1 %v1277_v3  ;;  %p919_p2 = scmp.gt.s32.totalorder %s1055_s24, 0 }
  0x14   :  { %409 = vmatpush.msrb.mxu2 %v1283_v4  ;;  %1026 = vmatmul.msk.f32.gmra.mxu0 %vm70_vm1, %v54_v39 }
  0x15   :  { %471 = vmatpush.msrb.mxu3 %v1277_v3  ;;  %346 = vmatpush.msra.mxu1 %v1283_v4  ;;  %s920_s25 = scalar_select %p919_p2, 1, 0 }
  0x16   :  { %410 = vmatpush.msrb.mxu2 %v1294_v6 }
  0x17   :  { %472 = vmatpush.msrb.mxu3 %v1283_v4  ;;  %347 = vmatpush.msra.mxu1 %v1294_v6 }
  0x18   :  { %411 = vmatpush.msrb.mxu2 %v1302_v7 }
  0x19   :  { %473 = vmatpush.msrb.mxu3 %v1294_v6  ;;  %348 = vmatpush.msra.mxu1 %v1302_v7 }
  0x1a   :  { %160 = vmatmul.f32.vlgmr.msrb.gmra.mxu1 %v1191_v9 }
  0x1b   :  { %474 = vmatpush.msrb.mxu3 %v1302_v7  ;;  %534 = vmatpush.msrb.mxu1 %v1277_v3 }
  0x1d   :  { %535 = vmatpush.msrb.mxu1 %v1283_v4 }
  0x1f   :  { %536 = vmatpush.msrb.mxu1 %v1294_v6 }
  0x21   :  { %537 = vmatpush.msrb.mxu1 %v1302_v7 }
  0x87   :  { %v1334_v10 = vpop.f32.mrf.mxu1 }
  0x88   :  { %v116_v12 = vpop.f32.mrf.mxu0 }
  0x89   :  { %v117_v14 = vadd.f32 %v1341_v13, %v116_v12 }
  0x8f   :  { %v1336_v11 = vpop.f32.mrf.mxu1 }
  0x91   :  { %v119_v41 = vpop.f32.mrf.mxu0 }
  0x92   :  { %v120_v42 = vadd.f32 %v1341_v13, %v119_v41 }
  0x97   :  { %v161_v15 = vpop.f32.mrf.mxu1 }
  0x98   :  { %v164_v16 = vadd.f32 %v161_v15, %v117_v14 }
  0x9a   :  { %1080 = vtanh.f32 %v164_v16  ;;  %v1033_v18 = vmul.f32 -1.442695, %v164_v16 }
  0x9c   :  { %1082 = vpow2.f32 %v1033_v18 }
  0xa0   :  { %v1081_v17 = vpop.eup %1080 }
  0xa1   :  { %187 = vrot.lane.b32.xlu0 %v1081_v17, %s1192_s18 }
  0xa2   :  { %v1083_v19 = vpop.eup %1082 }
  0xa3   :  { %v168_v20 = vadd.f32 1.0, %v1083_v19 }
  0xa5   :  { %1084 = vrcp.f32 %v168_v20  ;;  %v180_v26 = vand.u32 2147483648, %v168_v20  ;;  %vm174_vm3 = vweird.f32 %v168_v20  ;;  %v178_v27 = vand.u32 2147483647, %v168_v20 }
  0xa7   :  { %v181_v29 = vor.u32 1.1754944e-38, %v180_v26  ;;  %vm179_vm5 = vcmp.eq.f32.partialorder %v178_v27, 8.507059e+37 }
  0xab   :  { %v1085_v21 = vpop.eup %1084 }
  0xac   :  { %v170_v22 = vmul.f32 %v1085_v21, %v168_v20  ;;  %vm175_vm2 = vweird.f32 %v1085_v21 }
  0xad   :  { %vm176_vm4 = vmor %vm174_vm3, %vm175_vm2 }
  0xae   :  { %v171_v23 = vsub.f32 1.0, %v170_v22 }
  0xb0   :  { %v172_v24 = vmul.f32 %v1085_v21, %v171_v23 }
  0xb2   :  { %v173_v25 = vadd.f32 %v1085_v21, %v172_v24 }
  0xb4   :  { %v177_v28 = vsel %vm176_vm4, %v1085_v21, %v173_v25 }
  0xb5   :  { %v182_v31 = vsel %vm179_vm5, %v181_v29, %v177_v28 }
  0xb6   :  { %v185_v33 = vmul.f32 0.0, %v182_v31 }
 0x113   :  { %v188_v30 = vpop.permute.xlu0 %187 }
 0x114   :  { %v190_v32 = vmul.f32 %v188_v30, %v182_v31 }
 0x116   :  { %192 = vrot.lane.b32.xlu0 %v190_v32, %s1193_s5 }
 0x188   :  { %v193_v34 = vpop.permute.xlu0 %192 }
 0x189   :  { %v195_v35 = vadd.f32 %v193_v34, %v185_v33  ;;  %v56_v33 = vld [vmem:[%s1512_s0 + $0x18] sm:$0xff] }
 0x18b   :  { %1086 = vtanh.f32 %v195_v35 }
 0x191   :  { %v1087_v36 = vpop.eup %1086 }
 0x192   :  { %198 = vrot.lane.b32.xlu1 %v1087_v36, %s1192_s18 }
 0x204   :  { %v199_v37 = vpop.permute.xlu1 %198 }
 0x205   :  { %v201_v38 = vmul.f32 %v199_v37, %v182_v31 }
 0x207   :  { %203 = vrot.lane.b32.xlu1 %v201_v38, %s1193_s5 }
 0x279   :  { %v204_v40 = vpop.permute.xlu1 %203 }
 0x27a   :  { %1034 = vmatmul.msk.f32.vlgmr.msra.gmra.mxu2 %vm140_vm6, %v204_v40 }
 0x27b   :  { %597 = vmatpush.msra.mxu2 %v1277_v3  ;;  %v55_v3 = vld [vmem:[%s1512_s0 + $0x10] sm:$0xff] }
 0x27c   :  { %1027 = vmatmul.msk.f32.gmra.mxu0 %vm70_vm1, %v55_v3 }
 0x27d   :  { %598 = vmatpush.msra.mxu2 %v1283_v4 }
 0x27f   :  { %599 = vmatpush.msra.mxu2 %v1294_v6 }
 0x281   :  { %600 = vmatpush.msra.mxu2 %v1302_v7 }
 0x284   :  { %1028 = vmatmul.msk.f32.gmra.mxu0 %vm70_vm1, %v56_v33 }
 0x2f9   :  { %v122_v5 = vpop.f32.mrf.mxu0 }
 0x2fa   :  { %v123_v6 = vadd.f32 %v1341_v13, %v122_v5 }
 0x2fd   :  { %v224_v43 = vpop.f32.mrf.mxu2 }
 0x2fe   :  { %v227_v44 = vadd.f32 %v224_v43, %v120_v42 }
 0x300   :  { %1088 = vtanh.f32 %v227_v44  ;;  %v1035_v46 = vmul.f32 -1.442695, %v227_v44 }
 0x301   :  { %v125_v37 = vpop.f32.mrf.mxu0 }
 0x302   :  { %1090 = vpow2.f32 %v1035_v46  ;;  %v126_v38 = vadd.f32 %v1341_v13, %v125_v37 }
 0x306   :  { %v1089_v45 = vpop.eup %1088 }
 0x307   :  { %250 = vrot.lane.b32.xlu2 %v1089_v45, %s1192_s18 }
 0x308   :  { %v1091_v47 = vpop.eup %1090 }
 0x309   :  { %v231_v48 = vadd.f32 1.0, %v1091_v47 }
 0x30b   :  { %1092 = vrcp.f32 %v231_v48  ;;  %v243_v54 = vand.u32 2147483648, %v231_v48  ;;  %vm237_vm8 = vweird.f32 %v231_v48  ;;  %v241_v55 = vand.u32 2147483647, %v231_v48 }
 0x30d   :  { %v244_v57 = vor.u32 1.1754944e-38, %v243_v54  ;;  %vm242_vm10 = vcmp.eq.f32.partialorder %v241_v55, 8.507059e+37 }
 0x311   :  { %v1093_v49 = vpop.eup %1092 }
 0x312   :  { %v233_v50 = vmul.f32 %v1093_v49, %v231_v48  ;;  %vm238_vm7 = vweird.f32 %v1093_v49 }
 0x313   :  { %vm239_vm9 = vmor %vm237_vm8, %vm238_vm7 }
 0x314   :  { %v234_v51 = vsub.f32 1.0, %v233_v50 }
 0x316   :  { %v235_v52 = vmul.f32 %v1093_v49, %v234_v51 }
 0x318   :  { %v236_v53 = vadd.f32 %v1093_v49, %v235_v52 }
 0x31a   :  { %v240_v56 = vsel %vm239_vm9, %v1093_v49, %v236_v53 }
 0x31b   :  { %v245_v59 = vsel %vm242_vm10, %v244_v57, %v240_v56 }
 0x31c   :  { %v248_v61 = vmul.f32 %v245_v59, %v195_v35 }
 0x361   :  { %v251_v58 = vpop.permute.xlu2 %250 }
 0x362   :  { %v253_v60 = vmul.f32 %v251_v58, %v245_v59 }
 0x364   :  { %255 = vrot.lane.b32.xlu2 %v253_v60, %s1193_s5 }
 0x3be   :  { %v256_v62 = vpop.permute.xlu2 %255 }
 0x3bf   :  { %v258_v63 = vadd.f32 %v256_v62, %v248_v61 }
 0x3c1   :  { %1094 = vtanh.f32 %v258_v63 }
 0x3c7   :  { %v1095_v0 = vpop.eup %1094 }
 0x3c8   :  { %261 = vrot.lane.b32.xlu0 %v1095_v0, %s1192_s18 }
 0x43a   :  { %v262_v1 = vpop.permute.xlu0 %261 }
 0x43b   :  { %v264_v2 = vmul.f32 %v262_v1, %v245_v59 }
 0x43d   :  { %266 = vrot.lane.b32.xlu1 %v264_v2, %s1193_s5 }
 0x4af   :  { %v267_v4 = vpop.permute.xlu1 %266 }
 0x4b0   :  { %1036 = vmatmul.msk.f32.vlgmr.msra.gmra.mxu3 %vm140_vm6, %v267_v4 }
 0x533   :  { %v287_v7 = vpop.f32.mrf.mxu3 }
 0x534   :  { %v290_v9 = vadd.f32 %v287_v7, %v123_v6 }
 0x536   :  { %1096 = vtanh.f32 %v290_v9  ;;  %v1037_v14 = vmul.f32 -1.442695, %v290_v9 }
 0x538   :  { %1098 = vpow2.f32 %v1037_v14 }
 0x53c   :  { %v1097_v12 = vpop.eup %1096 }
 0x53d   :  { %313 = vrot.lane.b32.xlu2 %v1097_v12, %s1192_s18 }
 0x53e   :  { %v1099_v15 = vpop.eup %1098 }
 0x53f   :  { %v294_v16 = vadd.f32 1.0, %v1099_v15 }
 0x541   :  { %1100 = vrcp.f32 %v294_v16  ;;  %v306_v22 = vand.u32 2147483648, %v294_v16  ;;  %vm300_vm12 = vweird.f32 %v294_v16  ;;  %v304_v23 = vand.u32 2147483647, %v294_v16 }
 0x543   :  { %v307_v25 = vor.u32 1.1754944e-38, %v306_v22  ;;  %vm305_vm14 = vcmp.eq.f32.partialorder %v304_v23, 8.507059e+37 }
 0x547   :  { %v1101_v17 = vpop.eup %1100 }
 0x548   :  { %v296_v18 = vmul.f32 %v1101_v17, %v294_v16  ;;  %vm301_vm11 = vweird.f32 %v1101_v17 }
 0x549   :  { %vm302_vm13 = vmor %vm300_vm12, %vm301_vm11 }
 0x54a   :  { %v297_v19 = vsub.f32 1.0, %v296_v18 }
 0x54c   :  { %v298_v20 = vmul.f32 %v1101_v17, %v297_v19 }
 0x54e   :  { %v299_v21 = vadd.f32 %v1101_v17, %v298_v20 }
 0x550   :  { %v303_v24 = vsel %vm302_vm13, %v1101_v17, %v299_v21 }
 0x551   :  { %v308_v27 = vsel %vm305_vm14, %v307_v25, %v303_v24 }
 0x552   :  { %v311_v29 = vmul.f32 %v308_v27, %v258_v63  ;;  %v57_v63 = vld [vmem:[%s1512_s0 + $0x20] sm:$0xff] }
 0x553   :  { %1029 = vmatmul.msk.f32.gmra.mxu0 %vm70_vm1, %v57_v63 }
 0x597   :  { %v314_v26 = vpop.permute.xlu2 %313 }
 0x598   :  { %v316_v28 = vmul.f32 %v314_v26, %v308_v27 }
 0x59a   :  { %318 = vrot.lane.b32.xlu0 %v316_v28, %s1193_s5 }
 0x5d0   :  { %v128_v1 = vpop.f32.mrf.mxu0 }
 0x5d1   :  { %v129_v2 = vadd.f32 %v1341_v13, %v128_v1 }
 0x60c   :  { %v319_v30 = vpop.permute.xlu0 %318 }
 0x60d   :  { %v321_v31 = vadd.f32 %v319_v30, %v311_v29 }
 0x60f   :  { %1102 = vtanh.f32 %v321_v31 }
 0x615   :  { %v1103_v32 = vpop.eup %1102 }
 0x616   :  { %324 = vrot.lane.b32.xlu1 %v1103_v32, %s1192_s18 }
 0x688   :  { %v325_v34 = vpop.permute.xlu1 %324 }
 0x689   :  { %v327_v35 = vmul.f32 %v325_v34, %v308_v27 }
 0x68b   :  { %329 = vrot.lane.b32.xlu2 %v327_v35, %s1193_s5 }
 0x6e5   :  { %v330_v36 = vpop.permute.xlu2 %329 }
 0x6e6   :  { %1038 = vmatmul.msk.f32.vlgmr.msra.gmra.mxu1 %vm140_vm6, %v330_v36 }
 0x763   :  { %v350_v39 = vpop.f32.mrf.mxu1 }
 0x764   :  { %v353_v40 = vadd.f32 %v350_v39, %v126_v38 }
 0x766   :  { %1104 = vtanh.f32 %v353_v40  ;;  %v1039_v42 = vmul.f32 -1.442695, %v353_v40 }
 0x768   :  { %1106 = vpow2.f32 %v1039_v42 }
 0x76c   :  { %v1105_v41 = vpop.eup %1104 }
 0x76d   :  { %376 = vrot.lane.b32.xlu0 %v1105_v41, %s1192_s18 }
 0x76e   :  { %v1107_v43 = vpop.eup %1106 }
 0x76f   :  { %v357_v44 = vadd.f32 1.0, %v1107_v43 }
 0x771   :  { %1108 = vrcp.f32 %v357_v44  ;;  %v369_v50 = vand.u32 2147483648, %v357_v44  ;;  %vm363_vm0 = vweird.f32 %v357_v44  ;;  %v367_v51 = vand.u32 2147483647, %v357_v44 }
 0x773   :  { %v370_v53 = vor.u32 1.1754944e-38, %v369_v50  ;;  %vm368_vm3 = vcmp.eq.f32.partialorder %v367_v51, 8.507059e+37 }
 0x777   :  { %v1109_v45 = vpop.eup %1108 }
 0x778   :  { %v359_v46 = vmul.f32 %v1109_v45, %v357_v44  ;;  %vm364_vm15 = vweird.f32 %v1109_v45 }
 0x779   :  { %vm365_vm2 = vmor %vm363_vm0, %vm364_vm15 }
 0x77a   :  { %v360_v47 = vsub.f32 1.0, %v359_v46 }
 0x77c   :  { %v361_v48 = vmul.f32 %v1109_v45, %v360_v47 }
 0x77e   :  { %v362_v49 = vadd.f32 %v1109_v45, %v361_v48 }
 0x780   :  { %v366_v52 = vsel %vm365_vm2, %v1109_v45, %v362_v49 }
 0x781   :  { %v371_v55 = vsel %vm368_vm3, %v370_v53, %v366_v52 }
 0x782   :  { %v374_v57 = vmul.f32 %v371_v55, %v321_v31  ;;  %v58_v31 = vld [vmem:[%s1512_s0 + $0x28] sm:$0xff] }
 0x783   :  { %1030 = vmatmul.msk.f32.gmra.mxu0 %vm70_vm1, %v58_v31 }
 0x7df   :  { %v377_v54 = vpop.permute.xlu0 %376 }
 0x7e0   :  { %v379_v56 = vmul.f32 %v377_v54, %v371_v55 }
 0x7e2   :  { %381 = vrot.lane.b32.xlu1 %v379_v56, %s1193_s5 }
 0x800   :  { %v131_v33 = vpop.f32.mrf.mxu0 }
 0x801   :  { %v132_v34 = vadd.f32 %v1341_v13, %v131_v33 }
 0x854   :  { %v382_v58 = vpop.permute.xlu1 %381 }
 0x855   :  { %v384_v59 = vadd.f32 %v382_v58, %v374_v57 }
 0x857   :  { %1110 = vtanh.f32 %v384_v59 }
 0x85d   :  { %v1111_v60 = vpop.eup %1110 }
 0x85e   :  { %387 = vrot.lane.b32.xlu2 %v1111_v60, %s1192_s18  ;;  %v135_v60 = vadd.f32 %v1341_v13, %v1334_v10 }
 0x8b8   :  { %v388_v61 = vpop.permute.xlu2 %387 }
 0x8b9   :  { %v390_v62 = vmul.f32 %v388_v61, %v371_v55 }
 0x8bb   :  { %392 = vrot.lane.b32.xlu0 %v390_v62, %s1193_s5 }
 0x92d   :  { %v393_v0 = vpop.permute.xlu0 %392 }
 0x92e   :  { %1040 = vmatmul.msk.f32.vlgmr.msrb.gmra.mxu2 %vm140_vm6, %v393_v0 }
 0x9b1   :  { %v413_v3 = vpop.f32.mrf.mxu2 }
 0x9b2   :  { %v416_v4 = vadd.f32 %v413_v3, %v129_v2 }
 0x9b4   :  { %1112 = vtanh.f32 %v416_v4  ;;  %v1041_v6 = vmul.f32 -1.442695, %v416_v4 }
 0x9b6   :  { %1114 = vpow2.f32 %v1041_v6 }
 0x9ba   :  { %v1113_v5 = vpop.eup %1112 }
 0x9bb   :  { %439 = vrot.lane.b32.xlu1 %v1113_v5, %s1192_s18 }
 0x9bc   :  { %v1115_v7 = vpop.eup %1114 }
 0x9bd   :  { %v420_v9 = vadd.f32 1.0, %v1115_v7 }
 0x9bf   :  { %1116 = vrcp.f32 %v420_v9  ;;  %v432_v18 = vand.u32 2147483648, %v420_v9  ;;  %vm426_vm5 = vweird.f32 %v420_v9  ;;  %v430_v19 = vand.u32 2147483647, %v420_v9 }
 0x9c1   :  { %v433_v21 = vor.u32 1.1754944e-38, %v432_v18  ;;  %vm431_vm8 = vcmp.eq.f32.partialorder %v430_v19, 8.507059e+37 }
 0x9c5   :  { %v1117_v12 = vpop.eup %1116 }
 0x9c6   :  { %v422_v14 = vmul.f32 %v1117_v12, %v420_v9  ;;  %vm427_vm4 = vweird.f32 %v1117_v12 }
 0x9c7   :  { %vm428_vm7 = vmor %vm426_vm5, %vm427_vm4 }
 0x9c8   :  { %v423_v15 = vsub.f32 1.0, %v422_v14 }
 0x9ca   :  { %v424_v16 = vmul.f32 %v1117_v12, %v423_v15 }
 0x9cc   :  { %v425_v17 = vadd.f32 %v1117_v12, %v424_v16 }
 0x9ce   :  { %v429_v20 = vsel %vm428_vm7, %v1117_v12, %v425_v17 }
 0x9cf   :  { %v434_v23 = vsel %vm431_vm8, %v433_v21, %v429_v20 }
 0x9d0   :  { %v437_v25 = vmul.f32 %v434_v23, %v384_v59 }
 0xa2d   :  { %v440_v22 = vpop.permute.xlu1 %439 }
 0xa2e   :  { %v442_v24 = vmul.f32 %v440_v22, %v434_v23 }
 0xa30   :  { %444 = vrot.lane.b32.xlu2 %v442_v24, %s1193_s5 }
 0xa8a   :  { %v445_v26 = vpop.permute.xlu2 %444 }
 0xa8b   :  { %v447_v27 = vadd.f32 %v445_v26, %v437_v25  ;;  %v138_v25 = vadd.f32 %v1341_v13, %v1336_v11 }
 0xa8d   :  { %1118 = vtanh.f32 %v447_v27 }
 0xa93   :  { %v1119_v28 = vpop.eup %1118 }
 0xa94   :  { %450 = vrot.lane.b32.xlu0 %v1119_v28, %s1192_s18 }
 0xb06   :  { %v451_v29 = vpop.permute.xlu0 %450 }
 0xb07   :  { %v453_v30 = vmul.f32 %v451_v29, %v434_v23 }
 0xb09   :  { %455 = vrot.lane.b32.xlu1 %v453_v30, %s1193_s5 }
 0xb7b   :  { %v456_v32 = vpop.permute.xlu1 %455 }
 0xb7c   :  { %1042 = vmatmul.msk.f32.vlgmr.msrb.gmra.mxu3 %vm140_vm6, %v456_v32 }
 0xbff   :  { %v476_v35 = vpop.f32.mrf.mxu3 }
 0xc00   :  { %v479_v36 = vadd.f32 %v476_v35, %v132_v34 }
 0xc02   :  { %1120 = vtanh.f32 %v479_v36  ;;  %v1043_v38 = vmul.f32 -1.442695, %v479_v36 }
 0xc04   :  { %1122 = vpow2.f32 %v1043_v38 }
 0xc08   :  { %v1121_v37 = vpop.eup %1120 }
 0xc09   :  { %502 = vrot.lane.b32.xlu2 %v1121_v37, %s1192_s18 }
 0xc0a   :  { %v1123_v39 = vpop.eup %1122 }
 0xc0b   :  { %v483_v40 = vadd.f32 1.0, %v1123_v39 }
 0xc0d   :  { %1124 = vrcp.f32 %v483_v40  ;;  %v495_v46 = vand.u32 2147483648, %v483_v40  ;;  %vm489_vm9 = vweird.f32 %v483_v40  ;;  %v493_v47 = vand.u32 2147483647, %v483_v40 }
 0xc0f   :  { %v496_v49 = vor.u32 1.1754944e-38, %v495_v46  ;;  %vm494_vm11 = vcmp.eq.f32.partialorder %v493_v47, 8.507059e+37  ;;  %v647_v46 = vld [vmem:[%s1519_s7 + $0x18] sm:$0xff]  ;;  %v646_v47 = vld [vmem:[%s1519_s7 + $0x10] sm:$0xff] }
 0xc10   :  { %680 = vmatpush.msra.mxu3 %v647_v46  ;;  %773 = vmatpush.msra.mxu1 %v647_v46 }
 0xc11   :  { %862 = vmatpush.msrb.mxu2 %v647_v46 }
 0xc12   :  { %681 = vmatpush.msra.mxu3 %v646_v47  ;;  %774 = vmatpush.msra.mxu1 %v646_v47 }
 0xc13   :  { %v1125_v41 = vpop.eup %1124  ;;  %863 = vmatpush.msrb.mxu2 %v646_v47 }
 0xc14   :  { %v485_v42 = vmul.f32 %v1125_v41, %v483_v40  ;;  %vm490_vm1 = vweird.f32 %v1125_v41 }
 0xc15   :  { %vm491_vm10 = vmor %vm489_vm9, %vm490_vm1 }
 0xc16   :  { %v486_v43 = vsub.f32 1.0, %v485_v42 }
 0xc18   :  { %v487_v44 = vmul.f32 %v1125_v41, %v486_v43 }
 0xc1a   :  { %v488_v45 = vadd.f32 %v1125_v41, %v487_v44 }
 0xc1c   :  { %v492_v48 = vsel %vm491_vm10, %v1125_v41, %v488_v45 }
 0xc1d   :  { %v497_v51 = vsel %vm494_vm11, %v496_v49, %v492_v48  ;;  %v645_v48 = vld [vmem:[%s1519_s7 + $0x8] sm:$0xff]  ;;  %v644_v49 = vld [vmem:[%s1519_s7] sm:$0xff] }
 0xc1e   :  { %v500_v53 = vmul.f32 %v497_v51, %v447_v27  ;;  %682 = vmatpush.msra.mxu3 %v645_v48  ;;  %775 = vmatpush.msra.mxu1 %v645_v48 }
 0xc1f   :  { %864 = vmatpush.msrb.mxu2 %v645_v48 }
 0xc20   :  { %683 = vmatpush.msra.mxu3 %v644_v49  ;;  %776 = vmatpush.msra.mxu1 %v644_v49 }
 0xc21   :  { %865 = vmatpush.msrb.mxu2 %v644_v49 }
 0xc22   :  { %951 = vmatpush.msrb.mxu3 %v647_v46 }
 0xc24   :  { %952 = vmatpush.msrb.mxu3 %v646_v47 }
 0xc26   :  { %953 = vmatpush.msrb.mxu3 %v645_v48 }
 0xc28   :  { %954 = vmatpush.msrb.mxu3 %v644_v49 }
 0xc63   :  { %v503_v50 = vpop.permute.xlu2 %502 }
 0xc64   :  { %v505_v52 = vmul.f32 %v503_v50, %v497_v51 }
 0xc66   :  { %507 = vrot.lane.b32.xlu0 %v505_v52, %s1193_s5  ;;  %v1194_v52 = vmov 6  }
 0xc67   :  { %1071 = vset.pattern.permute.xlu2 %v1194_v52 }
 0xcd8   :  { %v508_v54 = vpop.permute.xlu0 %507 }
 0xcd9   :  { %v510_v55 = vadd.f32 %v508_v54, %v500_v53  ;;  %v1436_v54 = vld [vmem:[%s1518_s6] ss:$0 sm:$0xff] }
 0xcdb   :  { %1126 = vtanh.f32 %v510_v55 }
 0xce1   :  { %v1127_v56 = vpop.eup %1126 }
 0xce2   :  { %513 = vrot.lane.b32.xlu1 %v1127_v56, %s1192_s18 }
 0xd54   :  { %v514_v57 = vpop.permute.xlu1 %513 }
 0xd55   :  { %v516_v58 = vmul.f32 %v514_v57, %v497_v51  ;;  %v1442_v57 = vld [vmem:[%s1520_s8] ss:$0 sm:$0xff]  ;;  %s744_s8 = sld [smem:[#allocation3]] }
 0xd57   :  { %518 = vrot.lane.b32.xlu2 %v516_v58, %s1193_s5 }
 0xd5b   :  { %p745_p0 = scmp.gt.s32.totalorder %s744_s8, 0 }
 0xdb1   :  { %v519_v59 = vpop.permute.xlu2 %518 }
 0xdb2   :  { %1044 = vmatmul.msk.f32.vlgmr.msrb.gmra.mxu1 %vm140_vm6, %v519_v59 }
 0xe2f   :  { %v539_v61 = vpop.f32.mrf.mxu1 }
 0xe30   :  { %v542_v62 = vadd.f32 %v539_v61, %v135_v60 }
 0xe32   :  { %1128 = vtanh.f32 %v542_v62  ;;  %v1045_v0 = vmul.f32 -1.442695, %v542_v62 }
 0xe34   :  { %1130 = vpow2.f32 %v1045_v0  ;;  %v1078_v0 = vld [vmem:[%s1521_s9] ss:$0 sm:$0xff]  ;;  %s746_s9 = scalar_select %p745_p0, 1, 0 }
 0xe38   :  { %v1129_v63 = vpop.eup %1128 }
 0xe39   :  { %565 = vrot.lane.b32.xlu0 %v1129_v63, %s1192_s18 }
 0xe3a   :  { %v1131_v1 = vpop.eup %1130 }
 0xe3b   :  { %v546_v2 = vadd.f32 1.0, %v1131_v1 }
 0xe3d   :  { %1132 = vrcp.f32 %v546_v2  ;;  %v558_v9 = vand.u32 2147483648, %v546_v2  ;;  %vm552_vm13 = vweird.f32 %v546_v2  ;;  %v556_v10 = vand.u32 2147483647, %v546_v2 }
 0xe3f   :  { %v559_v14 = vor.u32 1.1754944e-38, %v558_v9  ;;  %vm557_vm15 = vcmp.eq.f32.partialorder %v556_v10, 8.507059e+37 }
 0xe43   :  { %v1133_v3 = vpop.eup %1132 }
 0xe44   :  { %v548_v4 = vmul.f32 %v1133_v3, %v546_v2  ;;  %vm553_vm12 = vweird.f32 %v1133_v3 }
 0xe45   :  { %vm554_vm14 = vmor %vm552_vm13, %vm553_vm12 }
 0xe46   :  { %v549_v5 = vsub.f32 1.0, %v548_v4 }
 0xe48   :  { %v550_v6 = vmul.f32 %v1133_v3, %v549_v5 }
 0xe4a   :  { %v551_v7 = vadd.f32 %v1133_v3, %v550_v6 }
 0xe4c   :  { %v555_v12 = vsel %vm554_vm14, %v1133_v3, %v551_v7 }
 0xe4d   :  { %v560_v16 = vsel %vm557_vm15, %v559_v14, %v555_v12 }
 0xe4e   :  { %v563_v18 = vmul.f32 %v560_v16, %v510_v55 }
 0xeab   :  { %v566_v15 = vpop.permute.xlu0 %565 }
 0xeac   :  { %v568_v17 = vmul.f32 %v566_v15, %v560_v16 }
 0xeae   :  { %570 = vrot.lane.b32.xlu1 %v568_v17, %s1193_s5 }
 0xf20   :  { %v571_v19 = vpop.permute.xlu1 %570 }
 0xf21   :  { %v573_v20 = vadd.f32 %v571_v19, %v563_v18 }
 0xf23   :  { %1134 = vtanh.f32 %v573_v20 }
 0xf29   :  { %v1135_v21 = vpop.eup %1134 }
 0xf2a   :  { %576 = vrot.lane.b32.xlu2 %v1135_v21, %s1192_s18 }
 0xf84   :  { %v577_v22 = vpop.permute.xlu2 %576 }
 0xf85   :  { %v579_v23 = vmul.f32 %v577_v22, %v560_v16 }
 0xf87   :  { %581 = vrot.lane.b32.xlu0 %v579_v23, %s1193_s5 }
 0xff9   :  { %v582_v24 = vpop.permute.xlu0 %581 }
 0xffa   :  { %1046 = vmatmul.msk.f32.vlgmr.msra.gmra.mxu2 %vm140_vm6, %v582_v24 }
0x107d   :  { %v602_v26 = vpop.f32.mrf.mxu2 }
0x107e   :  { %v605_v27 = vadd.f32 %v602_v26, %v138_v25 }
0x1080   :  { %1136 = vtanh.f32 %v605_v27  ;;  %v1047_v29 = vmul.f32 -1.442695, %v605_v27  ;;  %v1196_v27 = vmov 0  }
0x1081   :  { %1072 = vset.pattern.permute.xlu1 %v1196_v27 }
0x1082   :  { %1138 = vpow2.f32 %v1047_v29  ;;  %v747_v29 = vstv %s746_s9 }
0x1083   :  { %vm748_vm9 = vcmp.eq.s32.totalorder %v747_v29, 1 }
0x1086   :  { %v1137_v28 = vpop.eup %1136 }
0x1087   :  { %628 = vrot.lane.b32.xlu1 %v1137_v28, %s1192_s18  ;;  %v1459_v28 = vld [vmem:[#allocation2] ss:$0 sm:$0xff] }
0x1088   :  { %v1139_v30 = vpop.eup %1138 }
0x1089   :  { %v609_v31 = vadd.f32 1.0, %v1139_v30 }
0x108b   :  { %1140 = vrcp.f32 %v609_v31  ;;  %v621_v37 = vand.u32 2147483648, %v609_v31  ;;  %vm615_vm2 = vweird.f32 %v609_v31  ;;  %v619_v11 = vand.u32 2147483647, %v609_v31 }
0x108d   :  { %v622_v38 = vor.u32 1.1754944e-38, %v621_v37  ;;  %vm620_vm4 = vcmp.eq.f32.partialorder %v619_v11, 8.507059e+37 }
0x1091   :  { %v1141_v32 = vpop.eup %1140 }
0x1092   :  { %v611_v33 = vmul.f32 %v1141_v32, %v609_v31  ;;  %vm616_vm0 = vweird.f32 %v1141_v32  ;;  %v1464_v31 = vld [vmem:[%s1513_s1] sm:$0xff]  ;;  %s1197_s1 = smov 1  }
0x1093   :  { %vm617_vm3 = vmor %vm615_vm2, %vm616_vm0 }
0x1094   :  { %v612_v34 = vsub.f32 1.0, %v611_v33 }
0x1096   :  { %v613_v35 = vmul.f32 %v1141_v32, %v612_v34 }
0x1098   :  { %v614_v36 = vadd.f32 %v1141_v32, %v613_v35 }
0x109a   :  { %v618_v13 = vsel %vm617_vm3, %v1141_v32, %v614_v36 }
0x109b   :  { %v623_v40 = vsel %vm620_vm4, %v622_v38, %v618_v13 }
0x109c   :  { %v626_v42 = vmul.f32 %v623_v40, %v573_v20 }
0x10f9   :  { %v629_v39 = vpop.permute.xlu1 %628 }
0x10fa   :  { %v631_v41 = vmul.f32 %v629_v39, %v623_v40 }
0x10fc   :  { %633 = vrot.lane.b32.xlu2 %v631_v41, %s1193_s5 }
0x1104   :  { %656 = vperm.xlu2 %1071, %v1309_v8  }
0x1156   :  { %v634_v43 = vpop.permute.xlu2 %633 }
0x1157   :  { %v1414_v44 = vadd.f32 %v634_v43, %v626_v42 }
0x1159   :  { %1142 = vtanh.f32 %v1414_v44 }
0x115e   :  { %v657_v55 = vpop.permute.xlu2 %656 }
0x115f   :  { %v1143_v45 = vpop.eup %1142  ;;  %v662_v56 = vmul.f32 %v1436_v54, %v657_v55 }
0x1160   :  { %639 = vrot.lane.b32.xlu0 %v1143_v45, %s1192_s18 }
0x11d2   :  { %v640_v50 = vpop.permute.xlu0 %639 }
0x11d3   :  { %v642_v51 = vmul.f32 %v640_v50, %v623_v40 }
0x11d5   :  { %664 = vrot.lane.b32.xlu1 %v642_v51, %s1193_s5 }
0x1247   :  { %v665_v53 = vpop.permute.xlu1 %664 }
0x1248   :  { %1048 = vmatmul.msk.f32.vlgmr.msra.gmra.mxu3 %vm140_vm6, %v665_v53 }
0x12cb   :  { %v685_v58 = vpop.f32.mrf.mxu3 }
0x12cc   :  { %v688_v59 = vadd.f32 %v685_v58, %v662_v56 }
0x12ce   :  { %v689_v8 = vadd.f32 %v1442_v57, %v688_v59 }
0x12d0   :  { %1144 = vtanh.f32 %v689_v8  ;;  %v1049_v61 = vmul.f32 -1.442695, %v689_v8 }
0x12d2   :  { %1146 = vpow2.f32 %v1049_v61 }
0x12d6   :  { %v1145_v60 = vpop.eup %1144 }
0x12d7   :  { %712 = vrot.lane.b32.xlu0 %v1145_v60, %s1192_s18 }
0x12d8   :  { %v1147_v62 = vpop.eup %1146 }
0x12d9   :  { %v693_v63 = vadd.f32 1.0, %v1147_v62 }
0x12db   :  { %1148 = vrcp.f32 %v693_v63  ;;  %v705_v6 = vand.u32 2147483648, %v693_v63  ;;  %vm699_vm7 = vweird.f32 %v693_v63  ;;  %v703_v7 = vand.u32 2147483647, %v693_v63 }
0x12dd   :  { %v706_v10 = vor.u32 1.1754944e-38, %v705_v6  ;;  %vm704_vm1 = vcmp.eq.f32.partialorder %v703_v7, 8.507059e+37 }
0x12df   :  { %729 = vrot.lane.b32.xlu0 %v1078_v0, %s1195_s17 }
0x12e1   :  { %v1149_v1 = vpop.eup %1148 }
0x12e2   :  { %v695_v2 = vmul.f32 %v1149_v1, %v693_v63  ;;  %vm700_vm5 = vweird.f32 %v1149_v1 }
0x12e3   :  { %vm701_vm8 = vmor %vm699_vm7, %vm700_vm5 }
0x12e4   :  { %v696_v3 = vsub.f32 1.0, %v695_v2  ;;  %v1198_v2 = vmov 1  }
0x12e5   :  { %1073 = vset.pattern.permute.xlu2 %v1198_v2 }
0x12e6   :  { %v697_v4 = vmul.f32 %v1149_v1, %v696_v3  ;;  %v832_v3 = vstv %s831_s22 }
0x12e7   :  { %vm833_vm14 = vcmp.eq.s32.totalorder %v832_v3, 1 }
0x12e8   :  { %v698_v5 = vadd.f32 %v1149_v1, %v697_v4 }
0x12ea   :  { %v702_v9 = vsel %vm701_vm8, %v1149_v1, %v698_v5 }
0x12eb   :  { %v707_v14 = vsel %vm704_vm1, %v706_v10, %v702_v9 }
0x12ec   :  { %v710_v16 = vmul.f32 %v707_v14, %v1414_v44 }
0x1349   :  { %v713_v12 = vpop.permute.xlu0 %712 }
0x134a   :  { %v715_v15 = vmul.f32 %v713_v12, %v707_v14 }
0x134c   :  { %717 = vrot.lane.b32.xlu1 %v715_v15, %s1193_s5 }
0x1351   :  { %v1452_v21 = vpop.permute.xlu0 %729 }
0x13be   :  { %v718_v17 = vpop.permute.xlu1 %717 }
0x13bf   :  { %v720_v18 = vadd.f32 %v718_v17, %v710_v16 }
0x13c1   :  { %1150 = vtanh.f32 %v720_v18 }
0x13c7   :  { %v1151_v19 = vpop.eup %1150 }
0x13c8   :  { %723 = vrot.lane.b32.xlu2 %v1151_v19, %s1192_s18 }
0x1422   :  { %v724_v20 = vpop.permute.xlu2 %723 }
0x1423   :  { %v726_v22 = vmul.f32 %v724_v20, %v707_v14 }
0x1425   :  { %757 = vrot.lane.b32.xlu1 %v726_v22, %s1193_s5  ;;  %v732_v23 = vmul.f32 %v1452_v21, %v726_v22 }
0x1427   :  { %734 = vrot.lane.b32.xlu2 %v732_v23, %s1193_s5 }
0x1481   :  { %v735_v24 = vpop.permute.xlu2 %734 }
0x1482   :  { %v737_v25 = vsel %vm140_vm6, %v735_v24, 0.0 }
0x1483   :  { %738 = vadd.xlane.f32.xlu0 %v737_v25 }
0x1497   :  { %v758_v26 = vpop.permute.xlu1 %757 }
0x1498   :  { %1050 = vmatmul.msk.f32.vlgmr.msra.gmra.mxu1 %vm140_vm6, %v758_v26 }
0x14f6   :  { %v739_v30 = vpop.xlane.xlu0 %738 }
0x14f7   :  { %v1467_v32 = vadd.f32 %v1459_v28, %v739_v30 }
0x14f9   :  { %v749_v33 = vsel %vm748_vm9, %v1464_v31, %v1467_v32  ;;  %vm1011_vm9 = vcmask 7168  }
0x14fa   :  { %752 = vperm.xlu1 %1072, %v749_v33  }
0x1515   :  { %v778_v36 = vpop.f32.mrf.mxu1 }
0x156c   :  { %v753_v34 = vpop.permute.xlu1 %752 }
0x156d   :  { %v755_v35 = vmul.f32 %v1436_v54, %v753_v34 }
0x156f   :  { %v781_v37 = vadd.f32 %v778_v36, %v755_v35 }
0x1571   :  { %v782_v11 = vadd.f32 %v1442_v57, %v781_v37 }
0x1573   :  { %1152 = vtanh.f32 %v782_v11  ;;  %v1051_v38 = vmul.f32 -1.442695, %v782_v11 }
0x1575   :  { %1154 = vpow2.f32 %v1051_v38 }
0x1579   :  { %v1153_v13 = vpop.eup %1152 }
0x157a   :  { %805 = vrot.lane.b32.xlu2 %v1153_v13, %s1192_s18 }
0x157b   :  { %v1155_v39 = vpop.eup %1154 }
0x157c   :  { %v786_v40 = vadd.f32 1.0, %v1155_v39 }
0x157e   :  { %1156 = vrcp.f32 %v786_v40  ;;  %v798_v46 = vand.u32 2147483648, %v786_v40  ;;  %vm792_vm11 = vweird.f32 %v786_v40  ;;  %v796_v47 = vand.u32 2147483647, %v786_v40 }
0x1580   :  { %v799_v49 = vor.u32 1.1754944e-38, %v798_v46  ;;  %vm797_vm13 = vcmp.eq.f32.partialorder %v796_v47, 8.507059e+37 }
0x1584   :  { %v1157_v41 = vpop.eup %1156 }
0x1585   :  { %v788_v42 = vmul.f32 %v1157_v41, %v786_v40  ;;  %vm793_vm10 = vweird.f32 %v1157_v41 }
0x1586   :  { %vm794_vm12 = vmor %vm792_vm11, %vm793_vm10  ;;  %vm1013_vm10 = vcmask 15360   ;;  %vm1015_vm11 = vcmask 23552  }
0x1587   :  { %v789_v43 = vsub.f32 1.0, %v788_v42 }
0x1589   :  { %v790_v44 = vmul.f32 %v1157_v41, %v789_v43 }
0x158b   :  { %v791_v45 = vadd.f32 %v1157_v41, %v790_v44  ;;  %v1200_v44 = vmov 2  }
0x158c   :  { %1074 = vset.pattern.permute.xlu0 %v1200_v44 }
0x158d   :  { %v795_v48 = vsel %vm794_vm12, %v1157_v41, %v791_v45  ;;  %v921_v45 = vstv %s920_s25  ;;  %vm1017_vm12 = vcmask 31744  }
0x158e   :  { %v800_v51 = vsel %vm797_vm13, %v799_v49, %v795_v48  ;;  %vm922_vm4 = vcmp.eq.s32.totalorder %v921_v45, 1 }
0x158f   :  { %v803_v53 = vmul.f32 %v800_v51, %v720_v18 }
0x15d4   :  { %v806_v50 = vpop.permute.xlu2 %805 }
0x15d5   :  { %v808_v52 = vmul.f32 %v806_v50, %v800_v51 }
0x15d7   :  { %810 = vrot.lane.b32.xlu1 %v808_v52, %s1193_s5 }
0x1649   :  { %v811_v55 = vpop.permute.xlu1 %810 }
0x164a   :  { %v813_v56 = vadd.f32 %v811_v55, %v803_v53 }
0x164c   :  { %1158 = vtanh.f32 %v813_v56 }
0x1652   :  { %v1159_v58 = vpop.eup %1158 }
0x1653   :  { %816 = vrot.lane.b32.xlu2 %v1159_v58, %s1192_s18 }
0x16ad   :  { %v817_v59 = vpop.permute.xlu2 %816 }
0x16ae   :  { %v819_v8 = vmul.f32 %v817_v59, %v800_v51 }
0x16b0   :  { %v820_v60 = vmul.f32 %v819_v8, %v1452_v21  ;;  %846 = vrot.lane.b32.xlu1 %v819_v8, %s1193_s5 }
0x16b2   :  { %822 = vrot.lane.b32.xlu2 %v820_v60, %s1193_s5 }
0x170c   :  { %v823_v61 = vpop.permute.xlu2 %822 }
0x170d   :  { %v825_v62 = vsel %vm140_vm6, %v823_v61, 0.0 }
0x170e   :  { %826 = vadd.xlane.f32.xlu1 %v825_v62 }
0x1722   :  { %v847_v63 = vpop.permute.xlu1 %846 }
0x1723   :  { %1053 = vmatmul.msk.f32.vlgmr.msrb.gmra.mxu2 %vm140_vm6, %v847_v63 }
0x1781   :  { %v827_v0 = vpop.xlane.xlu1 %826 }
0x1782   :  { %v828_v1 = vadd.f32 %v1459_v28, %v827_v0 }
0x1784   :  { %835 = vrot.lane.b32.xlu2 %v828_v1, %s1197_s1 }
0x17a6   :  { %v867_v9 = vpop.f32.mrf.mxu2 }
0x17de   :  { %v1482_v4 = vpop.permute.xlu2 %835 }
0x17df   :  { %v838_v5 = vsel %vm833_vm14, %v1464_v31, %v1482_v4 }
0x17e0   :  { %841 = vperm.xlu2 %1073, %v838_v5  }
0x183a   :  { %v842_v6 = vpop.permute.xlu2 %841 }
0x183b   :  { %v844_v7 = vmul.f32 %v1436_v54, %v842_v6 }
0x183d   :  { %v870_v10 = vadd.f32 %v867_v9, %v844_v7 }
0x183f   :  { %v871_v12 = vadd.f32 %v1442_v57, %v870_v10 }
0x1841   :  { %1160 = vtanh.f32 %v871_v12  ;;  %v1054_v15 = vmul.f32 -1.442695, %v871_v12 }
0x1843   :  { %1162 = vpow2.f32 %v1054_v15 }
0x1847   :  { %v1161_v14 = vpop.eup %1160 }
0x1848   :  { %894 = vrot.lane.b32.xlu2 %v1161_v14, %s1192_s18 }
0x1849   :  { %v1163_v16 = vpop.eup %1162 }
0x184a   :  { %v875_v17 = vadd.f32 1.0, %v1163_v16 }
0x184c   :  { %1164 = vrcp.f32 %v875_v17  ;;  %v887_v24 = vand.u32 2147483648, %v875_v17  ;;  %vm881_vm0 = vweird.f32 %v875_v17  ;;  %v885_v25 = vand.u32 2147483647, %v875_v17 }
0x184e   :  { %v888_v27 = vor.u32 1.1754944e-38, %v887_v24  ;;  %vm886_vm3 = vcmp.eq.f32.partialorder %v885_v25, 8.507059e+37 }
0x1852   :  { %v1165_v18 = vpop.eup %1164 }
0x1853   :  { %v877_v19 = vmul.f32 %v1165_v18, %v875_v17  ;;  %vm882_vm15 = vweird.f32 %v1165_v18 }
0x1854   :  { %vm883_vm2 = vmor %vm881_vm0, %vm882_vm15 }
0x1855   :  { %v878_v20 = vsub.f32 1.0, %v877_v19 }
0x1857   :  { %v879_v22 = vmul.f32 %v1165_v18, %v878_v20 }
0x1859   :  { %v880_v23 = vadd.f32 %v1165_v18, %v879_v22 }
0x185b   :  { %v884_v26 = vsel %vm883_vm2, %v1165_v18, %v880_v23  ;;  %v1012_v18 = vsel %vm1011_vm9, %v1467_v32, %v1482_v4 }
0x185c   :  { %v889_v30 = vsel %vm886_vm3, %v888_v27, %v884_v26 }
0x185d   :  { %v892_v34 = vmul.f32 %v889_v30, %v813_v56 }
0x18a2   :  { %v895_v29 = vpop.permute.xlu2 %894 }
0x18a3   :  { %v897_v33 = vmul.f32 %v895_v29, %v889_v30 }
0x18a5   :  { %899 = vrot.lane.b32.xlu0 %v897_v33, %s1193_s5 }
0x1917   :  { %v900_v35 = vpop.permute.xlu0 %899 }
0x1918   :  { %v902_v36 = vadd.f32 %v900_v35, %v892_v34 }
0x191a   :  { %1166 = vtanh.f32 %v902_v36 }
0x1920   :  { %v1167_v37 = vpop.eup %1166 }
0x1921   :  { %905 = vrot.lane.b32.xlu2 %v1167_v37, %s1192_s18 }
0x197b   :  { %v906_v11 = vpop.permute.xlu2 %905 }
0x197c   :  { %v908_v13 = vmul.f32 %v906_v11, %v889_v30 }
0x197e   :  { %v909_v38 = vmul.f32 %v908_v13, %v1452_v21  ;;  %935 = vrot.lane.b32.xlu2 %v908_v13, %s1193_s5 }
0x1980   :  { %911 = vrot.lane.b32.xlu0 %v909_v38, %s1193_s5 }
0x19d8   :  { %v936_v39 = vpop.permute.xlu2 %935 }
0x19d9   :  { %1056 = vmatmul.msk.f32.vlgmr.msrb.gmra.mxu3 %vm140_vm6, %v936_v39 }
0x19f2   :  { %v912_v40 = vpop.permute.xlu0 %911 }
0x19f3   :  { %v914_v41 = vsel %vm140_vm6, %v912_v40, 0.0 }
0x19f4   :  { %915 = vadd.xlane.f32.xlu2 %v914_v41 }
0x1a5c   :  { %v956_v50 = vpop.f32.mrf.mxu3 }
0x1a67   :  { %v916_v42 = vpop.xlane.xlu2 %915 }
0x1a68   :  { %v917_v43 = vadd.f32 %v1459_v28, %v916_v42 }
0x1a6a   :  { %924 = vrot.lane.b32.xlu1 %v917_v43, %s1199_s23 }
0x1adc   :  { %v925_v46 = vpop.permute.xlu1 %924 }
0x1add   :  { %v927_v47 = vsel %vm922_vm4, %v1464_v31, %v925_v46  ;;  %v1014_v19 = vsel %vm1013_vm10, %v1012_v18, %v925_v46 }
0x1ade   :  { %930 = vperm.xlu0 %1074, %v927_v47  }
0x1b50   :  { %v931_v48 = vpop.permute.xlu0 %930 }
0x1b51   :  { %v933_v49 = vmul.f32 %v1436_v54, %v931_v48 }
0x1b53   :  { %v959_v51 = vadd.f32 %v956_v50, %v933_v49 }
0x1b55   :  { %v960_v52 = vadd.f32 %v1442_v57, %v959_v51 }
0x1b57   :  { %1168 = vtanh.f32 %v960_v52  ;;  %v1057_v55 = vmul.f32 -1.442695, %v960_v52 }
0x1b59   :  { %1170 = vpow2.f32 %v1057_v55 }
0x1b5d   :  { %v1169_v53 = vpop.eup %1168 }
0x1b5e   :  { %983 = vrot.lane.b32.xlu0 %v1169_v53, %s1192_s18 }
0x1b5f   :  { %v1171_v56 = vpop.eup %1170 }
0x1b60   :  { %v964_v58 = vadd.f32 1.0, %v1171_v56 }
0x1b62   :  { %1172 = vrcp.f32 %v964_v58  ;;  %v976_v54 = vand.u32 2147483648, %v964_v58  ;;  %vm970_vm7 = vweird.f32 %v964_v58  ;;  %v974_v62 = vand.u32 2147483647, %v964_v58 }
0x1b64   :  { %v977_v63 = vor.u32 1.1754944e-38, %v976_v54  ;;  %vm975_vm1 = vcmp.eq.f32.partialorder %v974_v62, 8.507059e+37 }
0x1b68   :  { %v1173_v59 = vpop.eup %1172 }
0x1b69   :  { %v966_v8 = vmul.f32 %v1173_v59, %v964_v58  ;;  %vm971_vm5 = vweird.f32 %v1173_v59 }
0x1b6a   :  { %vm972_vm8 = vmor %vm970_vm7, %vm971_vm5 }
0x1b6b   :  { %v967_v31 = vsub.f32 1.0, %v966_v8 }
0x1b6d   :  { %v968_v60 = vmul.f32 %v1173_v59, %v967_v31 }
0x1b6f   :  { %v969_v61 = vadd.f32 %v1173_v59, %v968_v60 }
0x1b71   :  { %v973_v57 = vsel %vm972_vm8, %v1173_v59, %v969_v61 }
0x1b72   :  { %v978_v1 = vsel %vm975_vm1, %v977_v63, %v973_v57 }
0x1b73   :  { %v981_v3 = vmul.f32 %v978_v1, %v902_v36 }
0x1bd0   :  { %v984_v0 = vpop.permute.xlu0 %983 }
0x1bd1   :  { %v986_v2 = vmul.f32 %v984_v0, %v978_v1 }
0x1bd3   :  { %988 = vrot.lane.b32.xlu1 %v986_v2, %s1193_s5 }
0x1c45   :  { %v989_v5 = vpop.permute.xlu1 %988 }
0x1c46   :  { %v991_v6 = vadd.f32 %v989_v5, %v981_v3 }
0x1c48   :  { %1174 = vtanh.f32 %v991_v6 }
0x1c4e   :  { %v1175_v7 = vpop.eup %1174 }
0x1c4f   :  { %994 = vrot.lane.b32.xlu0 %v1175_v7, %s1192_s18 }
0x1cc1   :  { %v995_v9 = vpop.permute.xlu0 %994 }
0x1cc2   :  { %v997_v10 = vmul.f32 %v995_v9, %v978_v1 }
0x1cc4   :  { %v998_v12 = vmul.f32 %v997_v10, %v1452_v21 }
0x1cc6   :  { %1000 = vrot.lane.b32.xlu1 %v998_v12, %s1193_s5 }
0x1d38   :  { %v1001_v14 = vpop.permute.xlu1 %1000 }
0x1d39   :  { %v1003_v15 = vsel %vm140_vm6, %v1001_v14, 0.0 }
0x1d3a   :  { %1004 = vadd.xlane.f32.xlu0 %v1003_v15 }
0x1dad   :  { %v1005_v16 = vpop.xlane.xlu0 %1004 }
0x1dae   :  { %v1006_v17 = vadd.f32 %v1459_v28, %v1005_v16 }
0x1db0   :  { %1008 = vrot.lane.b32.xlu2 %v1006_v17, %s1201_s26 }
0x1e0a   :  { %v1009_v21 = vpop.permute.xlu2 %1008 }
0x1e0b   :  { %v1016_v20 = vsel %vm1015_vm11, %v1014_v19, %v1009_v21 }
0x1e0c   :  { %1018 = vst.msk [vmem:[%s1523_s11] sm:$0xff] %vm1017_vm12, %v1016_v20 }
0x1e0d   :  { %1023 = vsyncpa [#allocation4], 1 }

</bundles_post_ra>
